<compile_context>
chip_gen: v5e
topology: v5e:2x2
jax: 0.10.0
libtpu: 0.0.40
codegen_flags: <defaults>
</compile_context>

<pallas_src>
import functools

import jax
import jax.numpy as jnp
from jax import lax
from jax.experimental import pallas as pl
from jax.experimental.pallas import tpu as pltpu


# ----------------------------------------------------------------------------
# Fused whole-model kernel (one batch chunk per grid step)
# ----------------------------------------------------------------------------
def _fused_lstm_kernel(x_ref, *args, hidden, num_layers, n_head1, unroll):
    """Whole forward pass for one (T, TB, .) time-major batch chunk.

    x_ref : (T, TB, D0)  bf16 time-major input chunk (VMEM)
    args  : per layer l: wih_t (D_l, 4H) bf16, whh_t (H, 4H) bf16, bias (1, 4H) f32
            then wcat (H, n1+n2) bf16, bcat (1, n1+n2) f32        fused fc1|fc2 head
            then out_ref (TB, n1+n2) f32                          merged output
            then pre_sc (T, TB, 4H) f32 scratch                   hoisted gates
            then seq_sc (T, TB, H) bf16 scratch                   only if num_layers > 1
    """
    H = hidden
    T, TB, _ = x_ref.shape
    nw = 3 * num_layers
    wcat_ref = args[nw]
    bcat_ref = args[nw + 1]
    out_ref = args[nw + 2]
    pre_sc = args[nw + 3]
    seq_sc = args[nw + 4] if num_layers > 1 else None

    h = None
    for l in range(num_layers):
        wih_ref = args[3 * l + 0]
        whh_ref = args[3 * l + 1]
        b_ref = args[3 * l + 2]
        d_in = wih_ref.shape[0]
        last_layer = (l == num_layers - 1)

        # ---- hoisted input projection + bias for the whole chunk -------------
        # One MXU-filling bf16 (T*TB, D_l) @ (D_l, 4H) matmul, f32 accumulation,
        # parked in VMEM scratch so it is NOT carried live through the recurrence.
        if l == 0:
            x_flat = x_ref[...].reshape(T * TB, d_in)
        else:
            x_flat = seq_sc[...].reshape(T * TB, H)
        pre = jnp.dot(x_flat, wih_ref[...], preferred_element_type=jnp.float32)
        pre_sc[...] = (pre + b_ref[...]).reshape(T, TB, 4 * H)

        whh = whh_ref[...]                        # (H, 4H) bf16, resident

        # ---- recurrence: bounded-unroll fori_loop, h/c carried as vregs ------
        def step(t, carry, *, _whh=whh, _last=last_layer):
            h, c = carry                          # f32 (TB, H)
            gates = pre_sc[t] + jnp.dot(h.astype(jnp.bfloat16), _whh,
                                        preferred_element_type=jnp.float32)
            if H >= 128:
                # large H: push each nonlinearity only on the lanes it needs
                if_g = jax.nn.sigmoid(gates[:, : 2 * H])
                i_g = if_g[:, :H]
                f_g = if_g[:, H:]
                g_g = jnp.tanh(gates[:, 2 * H: 3 * H])
                o_g = jax.nn.sigmoid(gates[:, 3 * H:])
            else:
                # small H: whole (TB, 4H) gate row is one vreg -> full-width is cheapest
                sg = jax.nn.sigmoid(gates)
                th = jnp.tanh(gates)
                i_g = sg[:, 0 * H: 1 * H]
                f_g = sg[:, 1 * H: 2 * H]
                g_g = th[:, 2 * H: 3 * H]
                o_g = sg[:, 3 * H: 4 * H]
            c = f_g * c + i_g * g_g
            h = o_g * jnp.tanh(c)
            if not _last:
                # leading-axis, lane-dense VMEM store; never touches HBM
                seq_sc[t] = h.astype(jnp.bfloat16)
            return h, c

        h0 = jnp.zeros((TB, H), jnp.float32)
        c0 = jnp.zeros((TB, H), jnp.float32)
        h, _ = lax.fori_loop(0, T, step, (h0, c0), unroll=unroll)

    # ---- fused heads: one bf16 matmul, one lane-contiguous store --------------
    logits = (jnp.dot(h.astype(jnp.bfloat16), wcat_ref[...],
                      preferred_element_type=jnp.float32) + bcat_ref[...])
    col = lax.broadcasted_iota(jnp.int32, logits.shape, 1)
    head1 = col < n_head1
    neg_inf = jnp.float32(-jnp.inf)
    m = jnp.max(jnp.where(head1, logits, neg_inf), axis=1, keepdims=True)
    s = jnp.sum(jnp.exp(jnp.where(head1, logits - m, neg_inf)), axis=1, keepdims=True)
    lse = m + jnp.log(s)
    # columns [0, n1): log_softmax(fc1), columns [n1, n1+n2): raw fc2
    out_ref[...] = jnp.where(head1, logits - lse, logits)


# ----------------------------------------------------------------------------
# Wrapper
# ----------------------------------------------------------------------------
def lstm_model_forward(x, params, task_type="mtl"):
    """x: (B, input_size, seq_len) -- same convention as the PyTorch module."""
    # Layout glue stays in XLA: module's permute(0,2,1) + time-major for the kernel.
    seq = jnp.transpose(x, (2, 0, 1)).astype(jnp.bfloat16)        # (T, B, D0)
    T, B, D0 = seq.shape
    layers = params["lstm"]
    num_layers = len(layers)
    H = layers[0]["whh_t"].shape[0]
    n1 = params["fc1_w_t"].shape[1]
    n2 = params["fc2_w_t"].shape[1]
    ncat = n1 + n2

    # Batch chunking: shard independent recurrences over a parallel grid axis
    # (second TensorCore on v7x, input DMA double-buffering, bounded VMEM
    # residency).  Chunks must be >=16 rows (bf16 sublane tiling) to block.
    TB = B
    for cand in (64, 32, 16):
        if B % cand == 0 and B // cand >= 2:
            TB = cand
            break
    grid = (B // TB,)

    # Bounded unroll that divides T (keeps LLO visibility at fixed code size).
    unroll = 1
    for u in (8, 4, 2):
        if T % u == 0:
            unroll = u
            break

    vmem = pl.BlockSpec(memory_space=pltpu.MemorySpace.VMEM)      # resident weights
    inputs = [seq]
    in_specs = [pl.BlockSpec((T, TB, D0), lambda b: (0, b, 0))]
    for layer in layers:
        inputs += [layer["wih_t"], layer["whh_t"], layer["bias"]]
        in_specs += [vmem, vmem, vmem]
    inputs += [params["fc_w_cat"], params["fc_b_cat"]]
    in_specs += [vmem, vmem]

    scratch_shapes = [pltpu.VMEM((T, TB, 4 * H), jnp.float32)]     # hoisted gates
    if num_layers > 1:
        scratch_shapes.append(pltpu.VMEM((T, TB, H), jnp.bfloat16))  # inter-layer seq

    # TODO(synk): for very long T on v7x (64 MiB VMEM), chunk the time axis so
    # pre_sc/seq_sc are per-chunk instead of whole-sequence resident.
    out = pl.pallas_call(
        functools.partial(_fused_lstm_kernel, hidden=H, num_layers=num_layers,
                          n_head1=n1, unroll=unroll),
        grid=grid,
        out_shape=jax.ShapeDtypeStruct((B, ncat), jnp.float32),
        in_specs=in_specs,
        out_specs=pl.BlockSpec((TB, ncat), lambda b: (b, 0)),
        scratch_shapes=scratch_shapes,
        compiler_params=pltpu.CompilerParams(
            dimension_semantics=("parallel",),
            vmem_limit_bytes=32 * 1024 * 1024),   # > v5e's 16 MiB default scope
    )(*inputs)

    log_sm = out[:, :n1]
    out2 = out[:, n1:]
    if task_type == "mtl":
        return log_sm, out2
    elif task_type == "t1":
        return log_sm, None
    else:
        return None, out2


# ----------------------------------------------------------------------------
# Deterministic parameter init (shapes match nn.LSTM / nn.Linear)
# ----------------------------------------------------------------------------
def init_params(key, input_size, hidden_size, num_layers, output_size):
    params = {"lstm": []}
    scale = 1.0 / jnp.sqrt(hidden_size)
    for l in range(num_layers):
        d_in = input_size if l == 0 else hidden_size
        key, k1, k2, k3, k4 = jax.random.split(key, 5)
        w_ih = jax.random.uniform(k1, (4 * hidden_size, d_in), jnp.float32, -scale, scale)
        w_hh = jax.random.uniform(k2, (4 * hidden_size, hidden_size), jnp.float32, -scale, scale)
        b_ih = jax.random.uniform(k3, (4 * hidden_size,), jnp.float32, -scale, scale)
        b_hh = jax.random.uniform(k4, (4 * hidden_size,), jnp.float32, -scale, scale)
        params["lstm"].append({
            "wih_t": w_ih.T.astype(jnp.bfloat16),      # (d_in, 4H) bf16 MXU operand
            "whh_t": w_hh.T.astype(jnp.bfloat16),      # (H, 4H)   bf16 MXU operand
            "bias": (b_ih + b_hh)[None, :],            # (1, 4H)   f32
        })
    key, k1, k2, k3, k4 = jax.random.split(key, 5)
    s1 = 1.0 / jnp.sqrt(hidden_size)
    fc1_w = jax.random.uniform(k1, (2, hidden_size), jnp.float32, -s1, s1)
    fc1_b = jax.random.uniform(k2, (2,), jnp.float32, -s1, s1)
    fc2_w = jax.random.uniform(k3, (output_size, hidden_size), jnp.float32, -s1, s1)
    fc2_b = jax.random.uniform(k4, (output_size,), jnp.float32, -s1, s1)
    params["fc1_w_t"] = fc1_w.T                        # (H, 2)  (kept f32 for shape/query)
    params["fc1_b"] = fc1_b[None, :]                   # (1, 2)
    params["fc2_w_t"] = fc2_w.T                        # (H, O)
    params["fc2_b"] = fc2_b[None, :]                   # (1, O)
    # fused head [fc1 | fc2] so the kernel does a single matmul + single store
    params["fc_w_cat"] = jnp.concatenate(
        [params["fc1_w_t"], params["fc2_w_t"]], axis=1).astype(jnp.bfloat16)
    params["fc_b_cat"] = jnp.concatenate([params["fc1_b"], params["fc2_b"]], axis=1)
    return params


# ----------------------------------------------------------------------------
if __name__ == "__main__":
    INPUT_SIZE = 4      # feature channels (per-timestep input dim after permute)
    HIDDEN = 32
    NUM_LAYERS = 2
    OUTPUT_SIZE = 3
    BATCH = 2
    SEQ = 8

    key = jax.random.PRNGKey(0)
    key, kx = jax.random.split(key)
    # x has the same layout the PyTorch module expects: (B, input_size, seq_len)
    x = jax.random.normal(kx, (BATCH, INPUT_SIZE, SEQ), dtype=jnp.float32)

    params = init_params(key, INPUT_SIZE, HIDDEN, NUM_LAYERS, OUTPUT_SIZE)

    fwd = jax.jit(functools.partial(lstm_model_forward, task_type="mtl"))
    log_sm, out2 = fwd(x, params)
    jax.block_until_ready((log_sm, out2))

    assert log_sm.shape == (BATCH, 2)
    assert out2.shape == (BATCH, OUTPUT_SIZE)
    # log_softmax rows should sum to ~1 in prob space
    assert jnp.allclose(jnp.sum(jnp.exp(log_sm), axis=1), 1.0, atol=1e-4)

    print("KERNEL_OK")
</pallas_src>

<mosaic_0001>
module attributes {stable_mosaic.version = 11 : i64} {
  func.func @_fused_lstm_kernel(%arg0: i32, %arg1: memref<8x2x4xbf16, #tpu.memory_space<vmem>>, %arg2: memref<4x128xbf16, #tpu.memory_space<vmem>>, %arg3: memref<32x128xbf16, #tpu.memory_space<vmem>>, %arg4: memref<1x128xf32, #tpu.memory_space<vmem>>, %arg5: memref<32x128xbf16, #tpu.memory_space<vmem>>, %arg6: memref<32x128xbf16, #tpu.memory_space<vmem>>, %arg7: memref<1x128xf32, #tpu.memory_space<vmem>>, %arg8: memref<32x5xbf16, #tpu.memory_space<vmem>>, %arg9: memref<1x5xf32, #tpu.memory_space<vmem>>, %arg10: memref<2x5xf32, #tpu.memory_space<vmem>>, %arg11: memref<8x2x128xf32, #tpu.memory_space<vmem>>, %arg12: memref<8x2x32xbf16, #tpu.memory_space<vmem>>) attributes {dimension_semantics = [#tpu.dimension_semantics<parallel>], iteration_bounds = array<i64: 1>, scalar_prefetch = 0 : i64, scratch_operands = 2 : i64, tpu.core_type = #tpu.core_type<tc>, window_params = [{transform_indices = @transform_0, window_bounds = array<i64: 8, 2, 4>}, {pipeline_mode = #tpu.pipeline_mode<synchronous>, transform_indices = @transform_1, window_bounds = array<i64: 4, 128>}, {pipeline_mode = #tpu.pipeline_mode<synchronous>, transform_indices = @transform_2, window_bounds = array<i64: 32, 128>}, {pipeline_mode = #tpu.pipeline_mode<synchronous>, transform_indices = @transform_3, window_bounds = array<i64: 1, 128>}, {pipeline_mode = #tpu.pipeline_mode<synchronous>, transform_indices = @transform_4, window_bounds = array<i64: 32, 128>}, {pipeline_mode = #tpu.pipeline_mode<synchronous>, transform_indices = @transform_5, window_bounds = array<i64: 32, 128>}, {pipeline_mode = #tpu.pipeline_mode<synchronous>, transform_indices = @transform_6, window_bounds = array<i64: 1, 128>}, {pipeline_mode = #tpu.pipeline_mode<synchronous>, transform_indices = @transform_7, window_bounds = array<i64: 32, 5>}, {pipeline_mode = #tpu.pipeline_mode<synchronous>, transform_indices = @transform_8, window_bounds = array<i64: 1, 5>}, {transform_indices = @transform_9, window_bounds = array<i64: 2, 5>}]} {
    %c0 = arith.constant 0 : index
    %c0_0 = arith.constant 0 : index
    %c0_1 = arith.constant 0 : index
    %0 = vector.load %arg1[%c0, %c0_0, %c0_1] : memref<8x2x4xbf16, #tpu.memory_space<vmem>>, vector<8x2x4xbf16>
    %1 = vector.shape_cast %0 : vector<8x2x4xbf16> to vector<16x4xbf16>
    %c0_2 = arith.constant 0 : index
    %c0_3 = arith.constant 0 : index
    %2 = vector.load %arg2[%c0_2, %c0_3] : memref<4x128xbf16, #tpu.memory_space<vmem>>, vector<4x128xbf16>
    %cst = arith.constant dense<0.000000e+00> : vector<16x128xf32>
    %3 = tpu.matmul %1, %2, %cst {dimension_numbers = #tpu.dot_dimension_numbers<[1], [0], [0], [1], [0, 0, 1, 1], [], []>} : vector<16x4xbf16>, vector<4x128xbf16>, vector<16x128xf32> -> vector<16x128xf32>
    %c0_4 = arith.constant 0 : index
    %c0_5 = arith.constant 0 : index
    %4 = vector.load %arg4[%c0_4, %c0_5] : memref<1x128xf32, #tpu.memory_space<vmem>>, vector<1x128xf32>
    %5 = vector.broadcast %4 : vector<1x128xf32> to vector<16x128xf32>
    %6 = arith.addf %3, %5 : vector<16x128xf32>
    %7 = vector.shape_cast %6 : vector<16x128xf32> to vector<8x2x128xf32>
    %c0_6 = arith.constant 0 : index
    %c0_7 = arith.constant 0 : index
    %c0_8 = arith.constant 0 : index
    %8 = vector.load %arg11[%c0_6, %c0_7, %c0_8] : memref<8x2x128xf32, #tpu.memory_space<vmem>>, vector<8x2x128xf32>
    tpu.vector_store %arg11[%c0_6, %c0_7, %c0_8], %7 {strides = array<i32>} : memref<8x2x128xf32, #tpu.memory_space<vmem>>, vector<8x2x128xf32>,
    %c0_9 = arith.constant 0 : index
    %c0_10 = arith.constant 0 : index
    %9 = vector.load %arg3[%c0_9, %c0_10] : memref<32x128xbf16, #tpu.memory_space<vmem>>, vector<32x128xbf16>
    %cst_11 = arith.constant 0.000000e+00 : f32
    %10 = vector.broadcast %cst_11 : f32 to vector<2x32xf32>
    %cst_12 = arith.constant 0.000000e+00 : f32
    %11 = vector.broadcast %cst_12 : f32 to vector<2x32xf32>
    %c0_i32 = arith.constant 0 : i32
    %12 = arith.index_cast %c0_i32 : i32 to index
    %c0_13 = arith.constant 0 : index
    %c0_14 = arith.constant 0 : index
    %13 = vector.load %arg11[%12, %c0_13, %c0_14] : memref<8x2x128xf32, #tpu.memory_space<vmem>>, vector<1x2x128xf32>
    %14 = vector.shape_cast %13 : vector<1x2x128xf32> to vector<2x128xf32>
    %15 = arith.truncf %10 : vector<2x32xf32> to vector<2x32xbf16>
    %cst_15 = arith.constant dense<0.000000e+00> : vector<2x128xf32>
    %16 = tpu.matmul %15, %9, %cst_15 {dimension_numbers = #tpu.dot_dimension_numbers<[1], [0], [0], [1], [0, 0, 1, 1], [], []>} : vector<2x32xbf16>, vector<32x128xbf16>, vector<2x128xf32> -> vector<2x128xf32>
    %17 = arith.addf %14, %16 : vector<2x128xf32>
    %18 = arith.negf %17 : vector<2x128xf32>
    %19 = math.exp %18 : vector<2x128xf32>
    %cst_16 = arith.constant 1.000000e+00 : f32
    %20 = vector.broadcast %cst_16 : f32 to vector<2x128xf32>
    %21 = arith.addf %20, %19 : vector<2x128xf32>
    %22 = arith.divf %20, %21 : vector<2x128xf32>
    %23 = math.tanh %17 : vector<2x128xf32>
    %24 = vector.extract_strided_slice %22 {offsets = [0, 0], sizes = [2, 32], strides = [1, 1]} : vector<2x128xf32> to vector<2x32xf32>
    %25 = vector.extract_strided_slice %22 {offsets = [0, 32], sizes = [2, 32], strides = [1, 1]} : vector<2x128xf32> to vector<2x32xf32>
    %26 = vector.extract_strided_slice %23 {offsets = [0, 64], sizes = [2, 32], strides = [1, 1]} : vector<2x128xf32> to vector<2x32xf32>
    %27 = vector.extract_strided_slice %22 {offsets = [0, 96], sizes = [2, 32], strides = [1, 1]} : vector<2x128xf32> to vector<2x32xf32>
    %28 = arith.mulf %25, %11 : vector<2x32xf32>
    %29 = arith.mulf %24, %26 : vector<2x32xf32>
    %30 = arith.addf %28, %29 : vector<2x32xf32>
    %31 = math.tanh %30 : vector<2x32xf32>
    %32 = arith.mulf %27, %31 : vector<2x32xf32>
    %33 = arith.truncf %32 : vector<2x32xf32> to vector<2x32xbf16>
    %34 = arith.index_cast %c0_i32 : i32 to index
    %c0_17 = arith.constant 0 : index
    %c0_18 = arith.constant 0 : index
    %35 = vector.load %arg12[%34, %c0_17, %c0_18] : memref<8x2x32xbf16, #tpu.memory_space<vmem>>, vector<1x2x32xbf16>
    %36 = vector.shape_cast %35 : vector<1x2x32xbf16> to vector<2x32xbf16>
    %37 = vector.shape_cast %33 : vector<2x32xbf16> to vector<1x2x32xbf16>
    tpu.vector_store %arg12[%34, %c0_17, %c0_18], %37 {strides = array<i32>} : memref<8x2x32xbf16, #tpu.memory_space<vmem>>, vector<1x2x32xbf16>,
    %c1_i32 = arith.constant 1 : i32
    %38 = arith.index_cast %c1_i32 : i32 to index
    %c0_19 = arith.constant 0 : index
    %c0_20 = arith.constant 0 : index
    %39 = vector.load %arg11[%38, %c0_19, %c0_20] : memref<8x2x128xf32, #tpu.memory_space<vmem>>, vector<1x2x128xf32>
    %40 = vector.shape_cast %39 : vector<1x2x128xf32> to vector<2x128xf32>
    %41 = arith.truncf %32 : vector<2x32xf32> to vector<2x32xbf16>
    %cst_21 = arith.constant dense<0.000000e+00> : vector<2x128xf32>
    %42 = tpu.matmul %41, %9, %cst_21 {dimension_numbers = #tpu.dot_dimension_numbers<[1], [0], [0], [1], [0, 0, 1, 1], [], []>} : vector<2x32xbf16>, vector<32x128xbf16>, vector<2x128xf32> -> vector<2x128xf32>
    %43 = arith.addf %40, %42 : vector<2x128xf32>
    %44 = arith.negf %43 : vector<2x128xf32>
    %45 = math.exp %44 : vector<2x128xf32>
    %cst_22 = arith.constant 1.000000e+00 : f32
    %46 = vector.broadcast %cst_22 : f32 to vector<2x128xf32>
    %47 = arith.addf %46, %45 : vector<2x128xf32>
    %48 = arith.divf %46, %47 : vector<2x128xf32>
    %49 = math.tanh %43 : vector<2x128xf32>
    %50 = vector.extract_strided_slice %48 {offsets = [0, 0], sizes = [2, 32], strides = [1, 1]} : vector<2x128xf32> to vector<2x32xf32>
    %51 = vector.extract_strided_slice %48 {offsets = [0, 32], sizes = [2, 32], strides = [1, 1]} : vector<2x128xf32> to vector<2x32xf32>
    %52 = vector.extract_strided_slice %49 {offsets = [0, 64], sizes = [2, 32], strides = [1, 1]} : vector<2x128xf32> to vector<2x32xf32>
    %53 = vector.extract_strided_slice %48 {offsets = [0, 96], sizes = [2, 32], strides = [1, 1]} : vector<2x128xf32> to vector<2x32xf32>
    %54 = arith.mulf %51, %30 : vector<2x32xf32>
    %55 = arith.mulf %50, %52 : vector<2x32xf32>
    %56 = arith.addf %54, %55 : vector<2x32xf32>
    %57 = math.tanh %56 : vector<2x32xf32>
    %58 = arith.mulf %53, %57 : vector<2x32xf32>
    %59 = arith.truncf %58 : vector<2x32xf32> to vector<2x32xbf16>
    %60 = arith.index_cast %c1_i32 : i32 to index
    %c0_23 = arith.constant 0 : index
    %c0_24 = arith.constant 0 : index
    %61 = vector.load %arg12[%60, %c0_23, %c0_24] : memref<8x2x32xbf16, #tpu.memory_space<vmem>>, vector<1x2x32xbf16>
    %62 = vector.shape_cast %61 : vector<1x2x32xbf16> to vector<2x32xbf16>
    %63 = vector.shape_cast %59 : vector<2x32xbf16> to vector<1x2x32xbf16>
    tpu.vector_store %arg12[%60, %c0_23, %c0_24], %63 {strides = array<i32>} : memref<8x2x32xbf16, #tpu.memory_space<vmem>>, vector<1x2x32xbf16>,
    %c2_i32 = arith.constant 2 : i32
    %64 = arith.index_cast %c2_i32 : i32 to index
    %c0_25 = arith.constant 0 : index
    %c0_26 = arith.constant 0 : index
    %65 = vector.load %arg11[%64, %c0_25, %c0_26] : memref<8x2x128xf32, #tpu.memory_space<vmem>>, vector<1x2x128xf32>
    %66 = vector.shape_cast %65 : vector<1x2x128xf32> to vector<2x128xf32>
    %67 = arith.truncf %58 : vector<2x32xf32> to vector<2x32xbf16>
    %cst_27 = arith.constant dense<0.000000e+00> : vector<2x128xf32>
    %68 = tpu.matmul %67, %9, %cst_27 {dimension_numbers = #tpu.dot_dimension_numbers<[1], [0], [0], [1], [0, 0, 1, 1], [], []>} : vector<2x32xbf16>, vector<32x128xbf16>, vector<2x128xf32> -> vector<2x128xf32>
    %69 = arith.addf %66, %68 : vector<2x128xf32>
    %70 = arith.negf %69 : vector<2x128xf32>
    %71 = math.exp %70 : vector<2x128xf32>
    %cst_28 = arith.constant 1.000000e+00 : f32
    %72 = vector.broadcast %cst_28 : f32 to vector<2x128xf32>
    %73 = arith.addf %72, %71 : vector<2x128xf32>
    %74 = arith.divf %72, %73 : vector<2x128xf32>
    %75 = math.tanh %69 : vector<2x128xf32>
    %76 = vector.extract_strided_slice %74 {offsets = [0, 0], sizes = [2, 32], strides = [1, 1]} : vector<2x128xf32> to vector<2x32xf32>
    %77 = vector.extract_strided_slice %74 {offsets = [0, 32], sizes = [2, 32], strides = [1, 1]} : vector<2x128xf32> to vector<2x32xf32>
    %78 = vector.extract_strided_slice %75 {offsets = [0, 64], sizes = [2, 32], strides = [1, 1]} : vector<2x128xf32> to vector<2x32xf32>
    %79 = vector.extract_strided_slice %74 {offsets = [0, 96], sizes = [2, 32], strides = [1, 1]} : vector<2x128xf32> to vector<2x32xf32>
    %80 = arith.mulf %77, %56 : vector<2x32xf32>
    %81 = arith.mulf %76, %78 : vector<2x32xf32>
    %82 = arith.addf %80, %81 : vector<2x32xf32>
    %83 = math.tanh %82 : vector<2x32xf32>
    %84 = arith.mulf %79, %83 : vector<2x32xf32>
    %85 = arith.truncf %84 : vector<2x32xf32> to vector<2x32xbf16>
    %86 = arith.index_cast %c2_i32 : i32 to index
    %c0_29 = arith.constant 0 : index
    %c0_30 = arith.constant 0 : index
    %87 = vector.load %arg12[%86, %c0_29, %c0_30] : memref<8x2x32xbf16, #tpu.memory_space<vmem>>, vector<1x2x32xbf16>
    %88 = vector.shape_cast %87 : vector<1x2x32xbf16> to vector<2x32xbf16>
    %89 = vector.shape_cast %85 : vector<2x32xbf16> to vector<1x2x32xbf16>
    tpu.vector_store %arg12[%86, %c0_29, %c0_30], %89 {strides = array<i32>} : memref<8x2x32xbf16, #tpu.memory_space<vmem>>, vector<1x2x32xbf16>,
    %c3_i32 = arith.constant 3 : i32
    %90 = arith.index_cast %c3_i32 : i32 to index
    %c0_31 = arith.constant 0 : index
    %c0_32 = arith.constant 0 : index
    %91 = vector.load %arg11[%90, %c0_31, %c0_32] : memref<8x2x128xf32, #tpu.memory_space<vmem>>, vector<1x2x128xf32>
    %92 = vector.shape_cast %91 : vector<1x2x128xf32> to vector<2x128xf32>
    %93 = arith.truncf %84 : vector<2x32xf32> to vector<2x32xbf16>
    %cst_33 = arith.constant dense<0.000000e+00> : vector<2x128xf32>
    %94 = tpu.matmul %93, %9, %cst_33 {dimension_numbers = #tpu.dot_dimension_numbers<[1], [0], [0], [1], [0, 0, 1, 1], [], []>} : vector<2x32xbf16>, vector<32x128xbf16>, vector<2x128xf32> -> vector<2x128xf32>
    %95 = arith.addf %92, %94 : vector<2x128xf32>
    %96 = arith.negf %95 : vector<2x128xf32>
    %97 = math.exp %96 : vector<2x128xf32>
    %cst_34 = arith.constant 1.000000e+00 : f32
    %98 = vector.broadcast %cst_34 : f32 to vector<2x128xf32>
    %99 = arith.addf %98, %97 : vector<2x128xf32>
    %100 = arith.divf %98, %99 : vector<2x128xf32>
    %101 = math.tanh %95 : vector<2x128xf32>
    %102 = vector.extract_strided_slice %100 {offsets = [0, 0], sizes = [2, 32], strides = [1, 1]} : vector<2x128xf32> to vector<2x32xf32>
    %103 = vector.extract_strided_slice %100 {offsets = [0, 32], sizes = [2, 32], strides = [1, 1]} : vector<2x128xf32> to vector<2x32xf32>
    %104 = vector.extract_strided_slice %101 {offsets = [0, 64], sizes = [2, 32], strides = [1, 1]} : vector<2x128xf32> to vector<2x32xf32>
    %105 = vector.extract_strided_slice %100 {offsets = [0, 96], sizes = [2, 32], strides = [1, 1]} : vector<2x128xf32> to vector<2x32xf32>
    %106 = arith.mulf %103, %82 : vector<2x32xf32>
    %107 = arith.mulf %102, %104 : vector<2x32xf32>
    %108 = arith.addf %106, %107 : vector<2x32xf32>
    %109 = math.tanh %108 : vector<2x32xf32>
    %110 = arith.mulf %105, %109 : vector<2x32xf32>
    %111 = arith.truncf %110 : vector<2x32xf32> to vector<2x32xbf16>
    %112 = arith.index_cast %c3_i32 : i32 to index
    %c0_35 = arith.constant 0 : index
    %c0_36 = arith.constant 0 : index
    %113 = vector.load %arg12[%112, %c0_35, %c0_36] : memref<8x2x32xbf16, #tpu.memory_space<vmem>>, vector<1x2x32xbf16>
    %114 = vector.shape_cast %113 : vector<1x2x32xbf16> to vector<2x32xbf16>
    %115 = vector.shape_cast %111 : vector<2x32xbf16> to vector<1x2x32xbf16>
    tpu.vector_store %arg12[%112, %c0_35, %c0_36], %115 {strides = array<i32>} : memref<8x2x32xbf16, #tpu.memory_space<vmem>>, vector<1x2x32xbf16>,
    %c4_i32 = arith.constant 4 : i32
    %116 = arith.index_cast %c4_i32 : i32 to index
    %c0_37 = arith.constant 0 : index
    %c0_38 = arith.constant 0 : index
    %117 = vector.load %arg11[%116, %c0_37, %c0_38] : memref<8x2x128xf32, #tpu.memory_space<vmem>>, vector<1x2x128xf32>
    %118 = vector.shape_cast %117 : vector<1x2x128xf32> to vector<2x128xf32>
    %119 = arith.truncf %110 : vector<2x32xf32> to vector<2x32xbf16>
    %cst_39 = arith.constant dense<0.000000e+00> : vector<2x128xf32>
    %120 = tpu.matmul %119, %9, %cst_39 {dimension_numbers = #tpu.dot_dimension_numbers<[1], [0], [0], [1], [0, 0, 1, 1], [], []>} : vector<2x32xbf16>, vector<32x128xbf16>, vector<2x128xf32> -> vector<2x128xf32>
    %121 = arith.addf %118, %120 : vector<2x128xf32>
    %122 = arith.negf %121 : vector<2x128xf32>
    %123 = math.exp %122 : vector<2x128xf32>
    %cst_40 = arith.constant 1.000000e+00 : f32
    %124 = vector.broadcast %cst_40 : f32 to vector<2x128xf32>
    %125 = arith.addf %124, %123 : vector<2x128xf32>
    %126 = arith.divf %124, %125 : vector<2x128xf32>
    %127 = math.tanh %121 : vector<2x128xf32>
    %128 = vector.extract_strided_slice %126 {offsets = [0, 0], sizes = [2, 32], strides = [1, 1]} : vector<2x128xf32> to vector<2x32xf32>
    %129 = vector.extract_strided_slice %126 {offsets = [0, 32], sizes = [2, 32], strides = [1, 1]} : vector<2x128xf32> to vector<2x32xf32>
    %130 = vector.extract_strided_slice %127 {offsets = [0, 64], sizes = [2, 32], strides = [1, 1]} : vector<2x128xf32> to vector<2x32xf32>
    %131 = vector.extract_strided_slice %126 {offsets = [0, 96], sizes = [2, 32], strides = [1, 1]} : vector<2x128xf32> to vector<2x32xf32>
    %132 = arith.mulf %129, %108 : vector<2x32xf32>
    %133 = arith.mulf %128, %130 : vector<2x32xf32>
    %134 = arith.addf %132, %133 : vector<2x32xf32>
    %135 = math.tanh %134 : vector<2x32xf32>
    %136 = arith.mulf %131, %135 : vector<2x32xf32>
    %137 = arith.truncf %136 : vector<2x32xf32> to vector<2x32xbf16>
    %138 = arith.index_cast %c4_i32 : i32 to index
    %c0_41 = arith.constant 0 : index
    %c0_42 = arith.constant 0 : index
    %139 = vector.load %arg12[%138, %c0_41, %c0_42] : memref<8x2x32xbf16, #tpu.memory_space<vmem>>, vector<1x2x32xbf16>
    %140 = vector.shape_cast %139 : vector<1x2x32xbf16> to vector<2x32xbf16>
    %141 = vector.shape_cast %137 : vector<2x32xbf16> to vector<1x2x32xbf16>
    tpu.vector_store %arg12[%138, %c0_41, %c0_42], %141 {strides = array<i32>} : memref<8x2x32xbf16, #tpu.memory_space<vmem>>, vector<1x2x32xbf16>,
    %c5_i32 = arith.constant 5 : i32
    %142 = arith.index_cast %c5_i32 : i32 to index
    %c0_43 = arith.constant 0 : index
    %c0_44 = arith.constant 0 : index
    %143 = vector.load %arg11[%142, %c0_43, %c0_44] : memref<8x2x128xf32, #tpu.memory_space<vmem>>, vector<1x2x128xf32>
    %144 = vector.shape_cast %143 : vector<1x2x128xf32> to vector<2x128xf32>
    %145 = arith.truncf %136 : vector<2x32xf32> to vector<2x32xbf16>
    %cst_45 = arith.constant dense<0.000000e+00> : vector<2x128xf32>
    %146 = tpu.matmul %145, %9, %cst_45 {dimension_numbers = #tpu.dot_dimension_numbers<[1], [0], [0], [1], [0, 0, 1, 1], [], []>} : vector<2x32xbf16>, vector<32x128xbf16>, vector<2x128xf32> -> vector<2x128xf32>
    %147 = arith.addf %144, %146 : vector<2x128xf32>
    %148 = arith.negf %147 : vector<2x128xf32>
    %149 = math.exp %148 : vector<2x128xf32>
    %cst_46 = arith.constant 1.000000e+00 : f32
    %150 = vector.broadcast %cst_46 : f32 to vector<2x128xf32>
    %151 = arith.addf %150, %149 : vector<2x128xf32>
    %152 = arith.divf %150, %151 : vector<2x128xf32>
    %153 = math.tanh %147 : vector<2x128xf32>
    %154 = vector.extract_strided_slice %152 {offsets = [0, 0], sizes = [2, 32], strides = [1, 1]} : vector<2x128xf32> to vector<2x32xf32>
    %155 = vector.extract_strided_slice %152 {offsets = [0, 32], sizes = [2, 32], strides = [1, 1]} : vector<2x128xf32> to vector<2x32xf32>
    %156 = vector.extract_strided_slice %153 {offsets = [0, 64], sizes = [2, 32], strides = [1, 1]} : vector<2x128xf32> to vector<2x32xf32>
    %157 = vector.extract_strided_slice %152 {offsets = [0, 96], sizes = [2, 32], strides = [1, 1]} : vector<2x128xf32> to vector<2x32xf32>
    %158 = arith.mulf %155, %134 : vector<2x32xf32>
    %159 = arith.mulf %154, %156 : vector<2x32xf32>
    %160 = arith.addf %158, %159 : vector<2x32xf32>
    %161 = math.tanh %160 : vector<2x32xf32>
    %162 = arith.mulf %157, %161 : vector<2x32xf32>
    %163 = arith.truncf %162 : vector<2x32xf32> to vector<2x32xbf16>
    %164 = arith.index_cast %c5_i32 : i32 to index
    %c0_47 = arith.constant 0 : index
    %c0_48 = arith.constant 0 : index
    %165 = vector.load %arg12[%164, %c0_47, %c0_48] : memref<8x2x32xbf16, #tpu.memory_space<vmem>>, vector<1x2x32xbf16>
    %166 = vector.shape_cast %165 : vector<1x2x32xbf16> to vector<2x32xbf16>
    %167 = vector.shape_cast %163 : vector<2x32xbf16> to vector<1x2x32xbf16>
    tpu.vector_store %arg12[%164, %c0_47, %c0_48], %167 {strides = array<i32>} : memref<8x2x32xbf16, #tpu.memory_space<vmem>>, vector<1x2x32xbf16>,
    %c6_i32 = arith.constant 6 : i32
    %168 = arith.index_cast %c6_i32 : i32 to index
    %c0_49 = arith.constant 0 : index
    %c0_50 = arith.constant 0 : index
    %169 = vector.load %arg11[%168, %c0_49, %c0_50] : memref<8x2x128xf32, #tpu.memory_space<vmem>>, vector<1x2x128xf32>
    %170 = vector.shape_cast %169 : vector<1x2x128xf32> to vector<2x128xf32>
    %171 = arith.truncf %162 : vector<2x32xf32> to vector<2x32xbf16>
    %cst_51 = arith.constant dense<0.000000e+00> : vector<2x128xf32>
    %172 = tpu.matmul %171, %9, %cst_51 {dimension_numbers = #tpu.dot_dimension_numbers<[1], [0], [0], [1], [0, 0, 1, 1], [], []>} : vector<2x32xbf16>, vector<32x128xbf16>, vector<2x128xf32> -> vector<2x128xf32>
    %173 = arith.addf %170, %172 : vector<2x128xf32>
    %174 = arith.negf %173 : vector<2x128xf32>
    %175 = math.exp %174 : vector<2x128xf32>
    %cst_52 = arith.constant 1.000000e+00 : f32
    %176 = vector.broadcast %cst_52 : f32 to vector<2x128xf32>
    %177 = arith.addf %176, %175 : vector<2x128xf32>
    %178 = arith.divf %176, %177 : vector<2x128xf32>
    %179 = math.tanh %173 : vector<2x128xf32>
    %180 = vector.extract_strided_slice %178 {offsets = [0, 0], sizes = [2, 32], strides = [1, 1]} : vector<2x128xf32> to vector<2x32xf32>
    %181 = vector.extract_strided_slice %178 {offsets = [0, 32], sizes = [2, 32], strides = [1, 1]} : vector<2x128xf32> to vector<2x32xf32>
    %182 = vector.extract_strided_slice %179 {offsets = [0, 64], sizes = [2, 32], strides = [1, 1]} : vector<2x128xf32> to vector<2x32xf32>
    %183 = vector.extract_strided_slice %178 {offsets = [0, 96], sizes = [2, 32], strides = [1, 1]} : vector<2x128xf32> to vector<2x32xf32>
    %184 = arith.mulf %181, %160 : vector<2x32xf32>
    %185 = arith.mulf %180, %182 : vector<2x32xf32>
    %186 = arith.addf %184, %185 : vector<2x32xf32>
    %187 = math.tanh %186 : vector<2x32xf32>
    %188 = arith.mulf %183, %187 : vector<2x32xf32>
    %189 = arith.truncf %188 : vector<2x32xf32> to vector<2x32xbf16>
    %190 = arith.index_cast %c6_i32 : i32 to index
    %c0_53 = arith.constant 0 : index
    %c0_54 = arith.constant 0 : index
    %191 = vector.load %arg12[%190, %c0_53, %c0_54] : memref<8x2x32xbf16, #tpu.memory_space<vmem>>, vector<1x2x32xbf16>
    %192 = vector.shape_cast %191 : vector<1x2x32xbf16> to vector<2x32xbf16>
    %193 = vector.shape_cast %189 : vector<2x32xbf16> to vector<1x2x32xbf16>
    tpu.vector_store %arg12[%190, %c0_53, %c0_54], %193 {strides = array<i32>} : memref<8x2x32xbf16, #tpu.memory_space<vmem>>, vector<1x2x32xbf16>,
    %c7_i32 = arith.constant 7 : i32
    %194 = arith.index_cast %c7_i32 : i32 to index
    %c0_55 = arith.constant 0 : index
    %c0_56 = arith.constant 0 : index
    %195 = vector.load %arg11[%194, %c0_55, %c0_56] : memref<8x2x128xf32, #tpu.memory_space<vmem>>, vector<1x2x128xf32>
    %196 = vector.shape_cast %195 : vector<1x2x128xf32> to vector<2x128xf32>
    %197 = arith.truncf %188 : vector<2x32xf32> to vector<2x32xbf16>
    %cst_57 = arith.constant dense<0.000000e+00> : vector<2x128xf32>
    %198 = tpu.matmul %197, %9, %cst_57 {dimension_numbers = #tpu.dot_dimension_numbers<[1], [0], [0], [1], [0, 0, 1, 1], [], []>} : vector<2x32xbf16>, vector<32x128xbf16>, vector<2x128xf32> -> vector<2x128xf32>
    %199 = arith.addf %196, %198 : vector<2x128xf32>
    %200 = arith.negf %199 : vector<2x128xf32>
    %201 = math.exp %200 : vector<2x128xf32>
    %cst_58 = arith.constant 1.000000e+00 : f32
    %202 = vector.broadcast %cst_58 : f32 to vector<2x128xf32>
    %203 = arith.addf %202, %201 : vector<2x128xf32>
    %204 = arith.divf %202, %203 : vector<2x128xf32>
    %205 = math.tanh %199 : vector<2x128xf32>
    %206 = vector.extract_strided_slice %204 {offsets = [0, 0], sizes = [2, 32], strides = [1, 1]} : vector<2x128xf32> to vector<2x32xf32>
    %207 = vector.extract_strided_slice %204 {offsets = [0, 32], sizes = [2, 32], strides = [1, 1]} : vector<2x128xf32> to vector<2x32xf32>
    %208 = vector.extract_strided_slice %205 {offsets = [0, 64], sizes = [2, 32], strides = [1, 1]} : vector<2x128xf32> to vector<2x32xf32>
    %209 = vector.extract_strided_slice %204 {offsets = [0, 96], sizes = [2, 32], strides = [1, 1]} : vector<2x128xf32> to vector<2x32xf32>
    %210 = arith.mulf %207, %186 : vector<2x32xf32>
    %211 = arith.mulf %206, %208 : vector<2x32xf32>
    %212 = arith.addf %210, %211 : vector<2x32xf32>
    %213 = math.tanh %212 : vector<2x32xf32>
    %214 = arith.mulf %209, %213 : vector<2x32xf32>
    %215 = arith.truncf %214 : vector<2x32xf32> to vector<2x32xbf16>
    %216 = arith.index_cast %c7_i32 : i32 to index
    %c0_59 = arith.constant 0 : index
    %c0_60 = arith.constant 0 : index
    %217 = vector.load %arg12[%216, %c0_59, %c0_60] : memref<8x2x32xbf16, #tpu.memory_space<vmem>>, vector<1x2x32xbf16>
    %218 = vector.shape_cast %217 : vector<1x2x32xbf16> to vector<2x32xbf16>
    %219 = vector.shape_cast %215 : vector<2x32xbf16> to vector<1x2x32xbf16>
    tpu.vector_store %arg12[%216, %c0_59, %c0_60], %219 {strides = array<i32>} : memref<8x2x32xbf16, #tpu.memory_space<vmem>>, vector<1x2x32xbf16>,
    %c8_i32 = arith.constant 8 : i32
    %c0_61 = arith.constant 0 : index
    %c0_62 = arith.constant 0 : index
    %c0_63 = arith.constant 0 : index
    %220 = vector.load %arg12[%c0_61, %c0_62, %c0_63] : memref<8x2x32xbf16, #tpu.memory_space<vmem>>, vector<8x2x32xbf16>
    %221 = vector.shape_cast %220 : vector<8x2x32xbf16> to vector<16x32xbf16>
    %c0_64 = arith.constant 0 : index
    %c0_65 = arith.constant 0 : index
    %222 = vector.load %arg5[%c0_64, %c0_65] : memref<32x128xbf16, #tpu.memory_space<vmem>>, vector<32x128xbf16>
    %cst_66 = arith.constant dense<0.000000e+00> : vector<16x128xf32>
    %223 = tpu.matmul %221, %222, %cst_66 {dimension_numbers = #tpu.dot_dimension_numbers<[1], [0], [0], [1], [0, 0, 1, 1], [], []>} : vector<16x32xbf16>, vector<32x128xbf16>, vector<16x128xf32> -> vector<16x128xf32>
    %c0_67 = arith.constant 0 : index
    %c0_68 = arith.constant 0 : index
    %224 = vector.load %arg7[%c0_67, %c0_68] : memref<1x128xf32, #tpu.memory_space<vmem>>, vector<1x128xf32>
    %225 = vector.broadcast %224 : vector<1x128xf32> to vector<16x128xf32>
    %226 = arith.addf %223, %225 : vector<16x128xf32>
    %227 = vector.shape_cast %226 : vector<16x128xf32> to vector<8x2x128xf32>
    %c0_69 = arith.constant 0 : index
    %c0_70 = arith.constant 0 : index
    %c0_71 = arith.constant 0 : index
    %228 = vector.load %arg11[%c0_69, %c0_70, %c0_71] : memref<8x2x128xf32, #tpu.memory_space<vmem>>, vector<8x2x128xf32>
    tpu.vector_store %arg11[%c0_69, %c0_70, %c0_71], %227 {strides = array<i32>} : memref<8x2x128xf32, #tpu.memory_space<vmem>>, vector<8x2x128xf32>,
    %c0_72 = arith.constant 0 : index
    %c0_73 = arith.constant 0 : index
    %229 = vector.load %arg6[%c0_72, %c0_73] : memref<32x128xbf16, #tpu.memory_space<vmem>>, vector<32x128xbf16>
    %cst_74 = arith.constant 0.000000e+00 : f32
    %230 = vector.broadcast %cst_74 : f32 to vector<2x32xf32>
    %cst_75 = arith.constant 0.000000e+00 : f32
    %231 = vector.broadcast %cst_75 : f32 to vector<2x32xf32>
    %c0_i32_76 = arith.constant 0 : i32
    %232 = arith.index_cast %c0_i32_76 : i32 to index
    %c0_77 = arith.constant 0 : index
    %c0_78 = arith.constant 0 : index
    %233 = vector.load %arg11[%232, %c0_77, %c0_78] : memref<8x2x128xf32, #tpu.memory_space<vmem>>, vector<1x2x128xf32>
    %234 = vector.shape_cast %233 : vector<1x2x128xf32> to vector<2x128xf32>
    %235 = arith.truncf %230 : vector<2x32xf32> to vector<2x32xbf16>
    %cst_79 = arith.constant dense<0.000000e+00> : vector<2x128xf32>
    %236 = tpu.matmul %235, %229, %cst_79 {dimension_numbers = #tpu.dot_dimension_numbers<[1], [0], [0], [1], [0, 0, 1, 1], [], []>} : vector<2x32xbf16>, vector<32x128xbf16>, vector<2x128xf32> -> vector<2x128xf32>
    %237 = arith.addf %234, %236 : vector<2x128xf32>
    %238 = arith.negf %237 : vector<2x128xf32>
    %239 = math.exp %238 : vector<2x128xf32>
    %cst_80 = arith.constant 1.000000e+00 : f32
    %240 = vector.broadcast %cst_80 : f32 to vector<2x128xf32>
    %241 = arith.addf %240, %239 : vector<2x128xf32>
    %242 = arith.divf %240, %241 : vector<2x128xf32>
    %243 = math.tanh %237 : vector<2x128xf32>
    %244 = vector.extract_strided_slice %242 {offsets = [0, 0], sizes = [2, 32], strides = [1, 1]} : vector<2x128xf32> to vector<2x32xf32>
    %245 = vector.extract_strided_slice %242 {offsets = [0, 32], sizes = [2, 32], strides = [1, 1]} : vector<2x128xf32> to vector<2x32xf32>
    %246 = vector.extract_strided_slice %243 {offsets = [0, 64], sizes = [2, 32], strides = [1, 1]} : vector<2x128xf32> to vector<2x32xf32>
    %247 = vector.extract_strided_slice %242 {offsets = [0, 96], sizes = [2, 32], strides = [1, 1]} : vector<2x128xf32> to vector<2x32xf32>
    %248 = arith.mulf %245, %231 : vector<2x32xf32>
    %249 = arith.mulf %244, %246 : vector<2x32xf32>
    %250 = arith.addf %248, %249 : vector<2x32xf32>
    %251 = math.tanh %250 : vector<2x32xf32>
    %252 = arith.mulf %247, %251 : vector<2x32xf32>
    %c1_i32_81 = arith.constant 1 : i32
    %253 = arith.index_cast %c1_i32_81 : i32 to index
    %c0_82 = arith.constant 0 : index
    %c0_83 = arith.constant 0 : index
    %254 = vector.load %arg11[%253, %c0_82, %c0_83] : memref<8x2x128xf32, #tpu.memory_space<vmem>>, vector<1x2x128xf32>
    %255 = vector.shape_cast %254 : vector<1x2x128xf32> to vector<2x128xf32>
    %256 = arith.truncf %252 : vector<2x32xf32> to vector<2x32xbf16>
    %cst_84 = arith.constant dense<0.000000e+00> : vector<2x128xf32>
    %257 = tpu.matmul %256, %229, %cst_84 {dimension_numbers = #tpu.dot_dimension_numbers<[1], [0], [0], [1], [0, 0, 1, 1], [], []>} : vector<2x32xbf16>, vector<32x128xbf16>, vector<2x128xf32> -> vector<2x128xf32>
    %258 = arith.addf %255, %257 : vector<2x128xf32>
    %259 = arith.negf %258 : vector<2x128xf32>
    %260 = math.exp %259 : vector<2x128xf32>
    %cst_85 = arith.constant 1.000000e+00 : f32
    %261 = vector.broadcast %cst_85 : f32 to vector<2x128xf32>
    %262 = arith.addf %261, %260 : vector<2x128xf32>
    %263 = arith.divf %261, %262 : vector<2x128xf32>
    %264 = math.tanh %258 : vector<2x128xf32>
    %265 = vector.extract_strided_slice %263 {offsets = [0, 0], sizes = [2, 32], strides = [1, 1]} : vector<2x128xf32> to vector<2x32xf32>
    %266 = vector.extract_strided_slice %263 {offsets = [0, 32], sizes = [2, 32], strides = [1, 1]} : vector<2x128xf32> to vector<2x32xf32>
    %267 = vector.extract_strided_slice %264 {offsets = [0, 64], sizes = [2, 32], strides = [1, 1]} : vector<2x128xf32> to vector<2x32xf32>
    %268 = vector.extract_strided_slice %263 {offsets = [0, 96], sizes = [2, 32], strides = [1, 1]} : vector<2x128xf32> to vector<2x32xf32>
    %269 = arith.mulf %266, %250 : vector<2x32xf32>
    %270 = arith.mulf %265, %267 : vector<2x32xf32>
    %271 = arith.addf %269, %270 : vector<2x32xf32>
    %272 = math.tanh %271 : vector<2x32xf32>
    %273 = arith.mulf %268, %272 : vector<2x32xf32>
    %c2_i32_86 = arith.constant 2 : i32
    %274 = arith.index_cast %c2_i32_86 : i32 to index
    %c0_87 = arith.constant 0 : index
    %c0_88 = arith.constant 0 : index
    %275 = vector.load %arg11[%274, %c0_87, %c0_88] : memref<8x2x128xf32, #tpu.memory_space<vmem>>, vector<1x2x128xf32>
    %276 = vector.shape_cast %275 : vector<1x2x128xf32> to vector<2x128xf32>
    %277 = arith.truncf %273 : vector<2x32xf32> to vector<2x32xbf16>
    %cst_89 = arith.constant dense<0.000000e+00> : vector<2x128xf32>
    %278 = tpu.matmul %277, %229, %cst_89 {dimension_numbers = #tpu.dot_dimension_numbers<[1], [0], [0], [1], [0, 0, 1, 1], [], []>} : vector<2x32xbf16>, vector<32x128xbf16>, vector<2x128xf32> -> vector<2x128xf32>
    %279 = arith.addf %276, %278 : vector<2x128xf32>
    %280 = arith.negf %279 : vector<2x128xf32>
    %281 = math.exp %280 : vector<2x128xf32>
    %cst_90 = arith.constant 1.000000e+00 : f32
    %282 = vector.broadcast %cst_90 : f32 to vector<2x128xf32>
    %283 = arith.addf %282, %281 : vector<2x128xf32>
    %284 = arith.divf %282, %283 : vector<2x128xf32>
    %285 = math.tanh %279 : vector<2x128xf32>
    %286 = vector.extract_strided_slice %284 {offsets = [0, 0], sizes = [2, 32], strides = [1, 1]} : vector<2x128xf32> to vector<2x32xf32>
    %287 = vector.extract_strided_slice %284 {offsets = [0, 32], sizes = [2, 32], strides = [1, 1]} : vector<2x128xf32> to vector<2x32xf32>
    %288 = vector.extract_strided_slice %285 {offsets = [0, 64], sizes = [2, 32], strides = [1, 1]} : vector<2x128xf32> to vector<2x32xf32>
    %289 = vector.extract_strided_slice %284 {offsets = [0, 96], sizes = [2, 32], strides = [1, 1]} : vector<2x128xf32> to vector<2x32xf32>
    %290 = arith.mulf %287, %271 : vector<2x32xf32>
    %291 = arith.mulf %286, %288 : vector<2x32xf32>
    %292 = arith.addf %290, %291 : vector<2x32xf32>
    %293 = math.tanh %292 : vector<2x32xf32>
    %294 = arith.mulf %289, %293 : vector<2x32xf32>
    %c3_i32_91 = arith.constant 3 : i32
    %295 = arith.index_cast %c3_i32_91 : i32 to index
    %c0_92 = arith.constant 0 : index
    %c0_93 = arith.constant 0 : index
    %296 = vector.load %arg11[%295, %c0_92, %c0_93] : memref<8x2x128xf32, #tpu.memory_space<vmem>>, vector<1x2x128xf32>
    %297 = vector.shape_cast %296 : vector<1x2x128xf32> to vector<2x128xf32>
    %298 = arith.truncf %294 : vector<2x32xf32> to vector<2x32xbf16>
    %cst_94 = arith.constant dense<0.000000e+00> : vector<2x128xf32>
    %299 = tpu.matmul %298, %229, %cst_94 {dimension_numbers = #tpu.dot_dimension_numbers<[1], [0], [0], [1], [0, 0, 1, 1], [], []>} : vector<2x32xbf16>, vector<32x128xbf16>, vector<2x128xf32> -> vector<2x128xf32>
    %300 = arith.addf %297, %299 : vector<2x128xf32>
    %301 = arith.negf %300 : vector<2x128xf32>
    %302 = math.exp %301 : vector<2x128xf32>
    %cst_95 = arith.constant 1.000000e+00 : f32
    %303 = vector.broadcast %cst_95 : f32 to vector<2x128xf32>
    %304 = arith.addf %303, %302 : vector<2x128xf32>
    %305 = arith.divf %303, %304 : vector<2x128xf32>
    %306 = math.tanh %300 : vector<2x128xf32>
    %307 = vector.extract_strided_slice %305 {offsets = [0, 0], sizes = [2, 32], strides = [1, 1]} : vector<2x128xf32> to vector<2x32xf32>
    %308 = vector.extract_strided_slice %305 {offsets = [0, 32], sizes = [2, 32], strides = [1, 1]} : vector<2x128xf32> to vector<2x32xf32>
    %309 = vector.extract_strided_slice %306 {offsets = [0, 64], sizes = [2, 32], strides = [1, 1]} : vector<2x128xf32> to vector<2x32xf32>
    %310 = vector.extract_strided_slice %305 {offsets = [0, 96], sizes = [2, 32], strides = [1, 1]} : vector<2x128xf32> to vector<2x32xf32>
    %311 = arith.mulf %308, %292 : vector<2x32xf32>
    %312 = arith.mulf %307, %309 : vector<2x32xf32>
    %313 = arith.addf %311, %312 : vector<2x32xf32>
    %314 = math.tanh %313 : vector<2x32xf32>
    %315 = arith.mulf %310, %314 : vector<2x32xf32>
    %c4_i32_96 = arith.constant 4 : i32
    %316 = arith.index_cast %c4_i32_96 : i32 to index
    %c0_97 = arith.constant 0 : index
    %c0_98 = arith.constant 0 : index
    %317 = vector.load %arg11[%316, %c0_97, %c0_98] : memref<8x2x128xf32, #tpu.memory_space<vmem>>, vector<1x2x128xf32>
    %318 = vector.shape_cast %317 : vector<1x2x128xf32> to vector<2x128xf32>
    %319 = arith.truncf %315 : vector<2x32xf32> to vector<2x32xbf16>
    %cst_99 = arith.constant dense<0.000000e+00> : vector<2x128xf32>
    %320 = tpu.matmul %319, %229, %cst_99 {dimension_numbers = #tpu.dot_dimension_numbers<[1], [0], [0], [1], [0, 0, 1, 1], [], []>} : vector<2x32xbf16>, vector<32x128xbf16>, vector<2x128xf32> -> vector<2x128xf32>
    %321 = arith.addf %318, %320 : vector<2x128xf32>
    %322 = arith.negf %321 : vector<2x128xf32>
    %323 = math.exp %322 : vector<2x128xf32>
    %cst_100 = arith.constant 1.000000e+00 : f32
    %324 = vector.broadcast %cst_100 : f32 to vector<2x128xf32>
    %325 = arith.addf %324, %323 : vector<2x128xf32>
    %326 = arith.divf %324, %325 : vector<2x128xf32>
    %327 = math.tanh %321 : vector<2x128xf32>
    %328 = vector.extract_strided_slice %326 {offsets = [0, 0], sizes = [2, 32], strides = [1, 1]} : vector<2x128xf32> to vector<2x32xf32>
    %329 = vector.extract_strided_slice %326 {offsets = [0, 32], sizes = [2, 32], strides = [1, 1]} : vector<2x128xf32> to vector<2x32xf32>
    %330 = vector.extract_strided_slice %327 {offsets = [0, 64], sizes = [2, 32], strides = [1, 1]} : vector<2x128xf32> to vector<2x32xf32>
    %331 = vector.extract_strided_slice %326 {offsets = [0, 96], sizes = [2, 32], strides = [1, 1]} : vector<2x128xf32> to vector<2x32xf32>
    %332 = arith.mulf %329, %313 : vector<2x32xf32>
    %333 = arith.mulf %328, %330 : vector<2x32xf32>
    %334 = arith.addf %332, %333 : vector<2x32xf32>
    %335 = math.tanh %334 : vector<2x32xf32>
    %336 = arith.mulf %331, %335 : vector<2x32xf32>
    %c5_i32_101 = arith.constant 5 : i32
    %337 = arith.index_cast %c5_i32_101 : i32 to index
    %c0_102 = arith.constant 0 : index
    %c0_103 = arith.constant 0 : index
    %338 = vector.load %arg11[%337, %c0_102, %c0_103] : memref<8x2x128xf32, #tpu.memory_space<vmem>>, vector<1x2x128xf32>
    %339 = vector.shape_cast %338 : vector<1x2x128xf32> to vector<2x128xf32>
    %340 = arith.truncf %336 : vector<2x32xf32> to vector<2x32xbf16>
    %cst_104 = arith.constant dense<0.000000e+00> : vector<2x128xf32>
    %341 = tpu.matmul %340, %229, %cst_104 {dimension_numbers = #tpu.dot_dimension_numbers<[1], [0], [0], [1], [0, 0, 1, 1], [], []>} : vector<2x32xbf16>, vector<32x128xbf16>, vector<2x128xf32> -> vector<2x128xf32>
    %342 = arith.addf %339, %341 : vector<2x128xf32>
    %343 = arith.negf %342 : vector<2x128xf32>
    %344 = math.exp %343 : vector<2x128xf32>
    %cst_105 = arith.constant 1.000000e+00 : f32
    %345 = vector.broadcast %cst_105 : f32 to vector<2x128xf32>
    %346 = arith.addf %345, %344 : vector<2x128xf32>
    %347 = arith.divf %345, %346 : vector<2x128xf32>
    %348 = math.tanh %342 : vector<2x128xf32>
    %349 = vector.extract_strided_slice %347 {offsets = [0, 0], sizes = [2, 32], strides = [1, 1]} : vector<2x128xf32> to vector<2x32xf32>
    %350 = vector.extract_strided_slice %347 {offsets = [0, 32], sizes = [2, 32], strides = [1, 1]} : vector<2x128xf32> to vector<2x32xf32>
    %351 = vector.extract_strided_slice %348 {offsets = [0, 64], sizes = [2, 32], strides = [1, 1]} : vector<2x128xf32> to vector<2x32xf32>
    %352 = vector.extract_strided_slice %347 {offsets = [0, 96], sizes = [2, 32], strides = [1, 1]} : vector<2x128xf32> to vector<2x32xf32>
    %353 = arith.mulf %350, %334 : vector<2x32xf32>
    %354 = arith.mulf %349, %351 : vector<2x32xf32>
    %355 = arith.addf %353, %354 : vector<2x32xf32>
    %356 = math.tanh %355 : vector<2x32xf32>
    %357 = arith.mulf %352, %356 : vector<2x32xf32>
    %c6_i32_106 = arith.constant 6 : i32
    %358 = arith.index_cast %c6_i32_106 : i32 to index
    %c0_107 = arith.constant 0 : index
    %c0_108 = arith.constant 0 : index
    %359 = vector.load %arg11[%358, %c0_107, %c0_108] : memref<8x2x128xf32, #tpu.memory_space<vmem>>, vector<1x2x128xf32>
    %360 = vector.shape_cast %359 : vector<1x2x128xf32> to vector<2x128xf32>
    %361 = arith.truncf %357 : vector<2x32xf32> to vector<2x32xbf16>
    %cst_109 = arith.constant dense<0.000000e+00> : vector<2x128xf32>
    %362 = tpu.matmul %361, %229, %cst_109 {dimension_numbers = #tpu.dot_dimension_numbers<[1], [0], [0], [1], [0, 0, 1, 1], [], []>} : vector<2x32xbf16>, vector<32x128xbf16>, vector<2x128xf32> -> vector<2x128xf32>
    %363 = arith.addf %360, %362 : vector<2x128xf32>
    %364 = arith.negf %363 : vector<2x128xf32>
    %365 = math.exp %364 : vector<2x128xf32>
    %cst_110 = arith.constant 1.000000e+00 : f32
    %366 = vector.broadcast %cst_110 : f32 to vector<2x128xf32>
    %367 = arith.addf %366, %365 : vector<2x128xf32>
    %368 = arith.divf %366, %367 : vector<2x128xf32>
    %369 = math.tanh %363 : vector<2x128xf32>
    %370 = vector.extract_strided_slice %368 {offsets = [0, 0], sizes = [2, 32], strides = [1, 1]} : vector<2x128xf32> to vector<2x32xf32>
    %371 = vector.extract_strided_slice %368 {offsets = [0, 32], sizes = [2, 32], strides = [1, 1]} : vector<2x128xf32> to vector<2x32xf32>
    %372 = vector.extract_strided_slice %369 {offsets = [0, 64], sizes = [2, 32], strides = [1, 1]} : vector<2x128xf32> to vector<2x32xf32>
    %373 = vector.extract_strided_slice %368 {offsets = [0, 96], sizes = [2, 32], strides = [1, 1]} : vector<2x128xf32> to vector<2x32xf32>
    %374 = arith.mulf %371, %355 : vector<2x32xf32>
    %375 = arith.mulf %370, %372 : vector<2x32xf32>
    %376 = arith.addf %374, %375 : vector<2x32xf32>
    %377 = math.tanh %376 : vector<2x32xf32>
    %378 = arith.mulf %373, %377 : vector<2x32xf32>
    %c7_i32_111 = arith.constant 7 : i32
    %379 = arith.index_cast %c7_i32_111 : i32 to index
    %c0_112 = arith.constant 0 : index
    %c0_113 = arith.constant 0 : index
    %380 = vector.load %arg11[%379, %c0_112, %c0_113] : memref<8x2x128xf32, #tpu.memory_space<vmem>>, vector<1x2x128xf32>
    %381 = vector.shape_cast %380 : vector<1x2x128xf32> to vector<2x128xf32>
    %382 = arith.truncf %378 : vector<2x32xf32> to vector<2x32xbf16>
    %cst_114 = arith.constant dense<0.000000e+00> : vector<2x128xf32>
    %383 = tpu.matmul %382, %229, %cst_114 {dimension_numbers = #tpu.dot_dimension_numbers<[1], [0], [0], [1], [0, 0, 1, 1], [], []>} : vector<2x32xbf16>, vector<32x128xbf16>, vector<2x128xf32> -> vector<2x128xf32>
    %384 = arith.addf %381, %383 : vector<2x128xf32>
    %385 = arith.negf %384 : vector<2x128xf32>
    %386 = math.exp %385 : vector<2x128xf32>
    %cst_115 = arith.constant 1.000000e+00 : f32
    %387 = vector.broadcast %cst_115 : f32 to vector<2x128xf32>
    %388 = arith.addf %387, %386 : vector<2x128xf32>
    %389 = arith.divf %387, %388 : vector<2x128xf32>
    %390 = math.tanh %384 : vector<2x128xf32>
    %391 = vector.extract_strided_slice %389 {offsets = [0, 0], sizes = [2, 32], strides = [1, 1]} : vector<2x128xf32> to vector<2x32xf32>
    %392 = vector.extract_strided_slice %389 {offsets = [0, 32], sizes = [2, 32], strides = [1, 1]} : vector<2x128xf32> to vector<2x32xf32>
    %393 = vector.extract_strided_slice %390 {offsets = [0, 64], sizes = [2, 32], strides = [1, 1]} : vector<2x128xf32> to vector<2x32xf32>
    %394 = vector.extract_strided_slice %389 {offsets = [0, 96], sizes = [2, 32], strides = [1, 1]} : vector<2x128xf32> to vector<2x32xf32>
    %395 = arith.mulf %392, %376 : vector<2x32xf32>
    %396 = arith.mulf %391, %393 : vector<2x32xf32>
    %397 = arith.addf %395, %396 : vector<2x32xf32>
    %398 = math.tanh %397 : vector<2x32xf32>
    %399 = arith.mulf %394, %398 : vector<2x32xf32>
    %c8_i32_116 = arith.constant 8 : i32
    %400 = arith.truncf %399 : vector<2x32xf32> to vector<2x32xbf16>
    %c0_117 = arith.constant 0 : index
    %c0_118 = arith.constant 0 : index
    %401 = vector.load %arg8[%c0_117, %c0_118] : memref<32x5xbf16, #tpu.memory_space<vmem>>, vector<32x5xbf16>
    %cst_119 = arith.constant dense<0.000000e+00> : vector<2x5xf32>
    %402 = tpu.matmul %400, %401, %cst_119 {dimension_numbers = #tpu.dot_dimension_numbers<[1], [0], [0], [1], [0, 0, 1, 1], [], []>} : vector<2x32xbf16>, vector<32x5xbf16>, vector<2x5xf32> -> vector<2x5xf32>
    %c0_120 = arith.constant 0 : index
    %c0_121 = arith.constant 0 : index
    %403 = vector.load %arg9[%c0_120, %c0_121] : memref<1x5xf32, #tpu.memory_space<vmem>>, vector<1x5xf32>
    %404 = vector.broadcast %403 : vector<1x5xf32> to vector<2x5xf32>
    %405 = arith.addf %402, %404 : vector<2x5xf32>
    %406 = tpu.iota {dimensions = array<i32: 1>} : vector<2x5xi32>
    %c2_i32_122 = arith.constant 2 : i32
    %407 = vector.broadcast %c2_i32_122 : i32 to vector<2x5xi32>
    %408 = arith.cmpi slt, %406, %407 : vector<2x5xi32>
    %cst_123 = arith.constant 0xFF800000 : f32
    %409 = vector.broadcast %cst_123 : f32 to vector<2x5xf32>
    %410 = arith.select %408, %405, %409 : vector<2x5xi1>, vector<2x5xf32>
    %cst_124 = arith.constant dense<0xFF800000> : vector<2xf32>
    %411 = vector.multi_reduction <maximumf>, %410, %cst_124 [1] : vector<2x5xf32> to vector<2xf32>
    %412 = vector.shape_cast %411 : vector<2xf32> to vector<2x1xf32>
    %413 = vector.broadcast %412 : vector<2x1xf32> to vector<2x5xf32>
    %414 = arith.subf %405, %413 : vector<2x5xf32>
    %cst_125 = arith.constant 0xFF800000 : f32
    %415 = vector.broadcast %cst_125 : f32 to vector<2x5xf32>
    %416 = arith.select %408, %414, %415 : vector<2x5xi1>, vector<2x5xf32>
    %417 = math.exp %416 : vector<2x5xf32>
    %cst_126 = arith.constant dense<0.000000e+00> : vector<2xf32>
    %418 = vector.multi_reduction <add>, %417, %cst_126 [1] : vector<2x5xf32> to vector<2xf32>
    %419 = vector.shape_cast %418 : vector<2xf32> to vector<2x1xf32>
    %420 = math.log %419 : vector<2x1xf32>
    %421 = arith.addf %412, %420 : vector<2x1xf32>
    %422 = vector.broadcast %421 : vector<2x1xf32> to vector<2x5xf32>
    %423 = arith.subf %405, %422 : vector<2x5xf32>
    %424 = arith.select %408, %423, %405 : vector<2x5xi1>, vector<2x5xf32>
    %c0_127 = arith.constant 0 : index
    %c0_128 = arith.constant 0 : index
    %425 = vector.load %arg10[%c0_127, %c0_128] : memref<2x5xf32, #tpu.memory_space<vmem>>, vector<2x5xf32>
    tpu.vector_store %arg10[%c0_127, %c0_128], %424 {strides = array<i32>} : memref<2x5xf32, #tpu.memory_space<vmem>>, vector<2x5xf32>,
    return
  }
  func.func @transform_0(%arg0: i32) -> (i32, i32, i32) {
    %c0_i32 = arith.constant 0 : i32
    %c0_i32_0 = arith.constant 0 : i32
    %c0_i32_1 = arith.constant 0 : i32
    return %c0_i32, %arg0, %c0_i32_0 : i32, i32, i32
  }
  func.func @transform_1(%arg0: i32) -> (i32, i32) {
    %c0_i32 = arith.constant 0 : i32
    %c0_i32_0 = arith.constant 0 : i32
    %c0_i32_1 = arith.constant 0 : i32
    return %c0_i32, %c0_i32_0 : i32, i32
  }
  func.func @transform_2(%arg0: i32) -> (i32, i32) {
    %c0_i32 = arith.constant 0 : i32
    %c0_i32_0 = arith.constant 0 : i32
    %c0_i32_1 = arith.constant 0 : i32
    return %c0_i32, %c0_i32_0 : i32, i32
  }
  func.func @transform_3(%arg0: i32) -> (i32, i32) {
    %c0_i32 = arith.constant 0 : i32
    %c0_i32_0 = arith.constant 0 : i32
    %c0_i32_1 = arith.constant 0 : i32
    return %c0_i32, %c0_i32_0 : i32, i32
  }
  func.func @transform_4(%arg0: i32) -> (i32, i32) {
    %c0_i32 = arith.constant 0 : i32
    %c0_i32_0 = arith.constant 0 : i32
    %c0_i32_1 = arith.constant 0 : i32
    return %c0_i32, %c0_i32_0 : i32, i32
  }
  func.func @transform_5(%arg0: i32) -> (i32, i32) {
    %c0_i32 = arith.constant 0 : i32
    %c0_i32_0 = arith.constant 0 : i32
    %c0_i32_1 = arith.constant 0 : i32
    return %c0_i32, %c0_i32_0 : i32, i32
  }
  func.func @transform_6(%arg0: i32) -> (i32, i32) {
    %c0_i32 = arith.constant 0 : i32
    %c0_i32_0 = arith.constant 0 : i32
    %c0_i32_1 = arith.constant 0 : i32
    return %c0_i32, %c0_i32_0 : i32, i32
  }
  func.func @transform_7(%arg0: i32) -> (i32, i32) {
    %c0_i32 = arith.constant 0 : i32
    %c0_i32_0 = arith.constant 0 : i32
    %c0_i32_1 = arith.constant 0 : i32
    return %c0_i32, %c0_i32_0 : i32, i32
  }
  func.func @transform_8(%arg0: i32) -> (i32, i32) {
    %c0_i32 = arith.constant 0 : i32
    %c0_i32_0 = arith.constant 0 : i32
    %c0_i32_1 = arith.constant 0 : i32
    return %c0_i32, %c0_i32_0 : i32, i32
  }
  func.func @transform_9(%arg0: i32) -> (i32, i32) {
    %c0_i32 = arith.constant 0 : i32
    %c0_i32_0 = arith.constant 0 : i32
    return %arg0, %c0_i32 : i32, i32
  }
}

</mosaic_0001>

<bundles_post_ra>
// kernel: lstm_model_forward.1
= control target key start
LH: loop header
LB: loop body
LE: loop exit
PB: predicated region body
PF: predicated region fallthrough
CT: control target
= control target key end

     0   :  { %14 = vsyncpa [#allocation5], 0  ;;  %s1594_s12 = smov [#allocation4]   ;;  %s1595_s14 = smov 64   ;;  %s1856_s0 = inlined_call_operand.vmem [shape: bf16[8,2,4], index: 0, kind: input, shape index: {}]   ;;  %s1857_s1 = inlined_call_operand.vmem [shape: bf16[4,128], index: 1, kind: input, shape index: {}]   ;;  %s1858_s2 = inlined_call_operand.vmem [shape: bf16[32,128], index: 2, kind: input, shape index: {}]   ;;  %s1859_s3 = inlined_call_operand.vmem [shape: f32[1,128], index: 3, kind: input, shape index: {}]   ;;  %s1860_s4 = inlined_call_operand.vmem [shape: bf16[32,128], index: 4, kind: input, shape index: {}]   ;;  %s1861_s5 = inlined_call_operand.hbm [shape: bf16[32,128], index: 5, kind: input, shape index: {}]   ;;  %s1862_s6 = inlined_call_operand.vmem [shape: f32[1,128], index: 6, kind: input, shape index: {}]   ;;  %s1863_s7 = inlined_call_operand.vmem [shape: bf16[32,5], index: 7, kind: input, shape index: {}]   ;;  %s1864_s8 = inlined_call_operand.vmem [shape: f32[1,5], index: 8, kind: input, shape index: {}]   ;;  %s1865_s9 = inlined_call_operand.vmem [shape: f32[2,5], index: 9, kind: output, shape index: {}]  }
   0x1   :  { %s29_s11 = sshll.u32 %s1861_s5, 4  ;;  %s31_s13 = sshll.u32 %s1594_s12, 4  ;;  %s30_s11 = int_to_ptr.hbm [resolvable:$true] %s29_s11  ;;  %s32_s13 = int_to_ptr.vmem [resolvable:$true] %s31_s13 }
   0x2   :  { %s1596_s15 = smov 4  }
   0x3   :  { %37 = dma.hbm_to_vmem [thread:$0]  %s30_s11, 256, %s32_s13, [#allocation5], %s1595_s14, %s1595_s14, %s1596_s15  }
   0x4   :  { %1592 = dma.done.wait [#allocation5], 256  }
   0x5   :  { %1593 = vsyncadd [#allocation5], 4294967040  ;;  %vm89_vm0 = vcmask 1041408   ;;  %v1421_v0 = vld [vmem:[%s1858_s2 + $0x8] sm:$0xff]  ;;  %v57_v1 = vld [vmem:[%s1857_s1] sm:$0x3] }
   0x6   :  { %v91_v2 = vsel %vm89_vm0, %v57_v1, 0  ;;  %v49_v3 = vld [vmem:[%s1856_s0] sm:$0x1]  ;;  %156 = vmatpush.bf16.msra.mxu1 %v1421_v0  ;;  %v50_v5 = vld [vmem:[%s1856_s0 + $0x1] sm:$0x1]  ;;  %229 = vmatpush.bf16.msra.mxu2 %v1421_v0  ;;  %v1597_v12 = vmov 0  }
   0x7   :  { %100 = vmatpush.bf16.msra.mxu0 %v91_v2  ;;  %v1420_v4 = vld [vmem:[%s1858_s2] sm:$0xff]  ;;  %301 = vmatpush.bf16.msra.mxu3 %v1421_v0  ;;  %63 = vst [vmem:[#allocation1] ss:$9 sm:$0xff] %v49_v3  ;;  %vm86_vm1 = vcmask 31744   ;;  %vm146_vm6 = vcmask 261120  }
   0x8   :  { %v51_v6 = vld [vmem:[%s1856_s0 + $0x2] sm:$0x1]  ;;  %v52_v7 = vld [vmem:[%s1856_s0 + $0x3] sm:$0x1]  ;;  %v53_v8 = vld [vmem:[%s1856_s0 + $0x4] sm:$0x1] }
   0x9   :  { %66 = vst [vmem:[#allocation1 + $0x1] ss:$9 sm:$0xff] %v50_v5  ;;  %v54_v9 = vld [vmem:[%s1856_s0 + $0x5] sm:$0x1]  ;;  %v55_v10 = vld [vmem:[%s1856_s0 + $0x6] sm:$0x1] }
   0xa   :  { %157 = vmatpush.bf16.msra.mxu1 %v1420_v4  ;;  %69 = vst [vmem:[#allocation1 + $0x2] ss:$9 sm:$0xff] %v51_v6  ;;  %230 = vmatpush.bf16.msra.mxu2 %v1420_v4  ;;  %v56_v11 = vld [vmem:[%s1856_s0 + $0x7] sm:$0x1]  ;;  %v1433_v15 = vld [vmem:[%s1859_s3] ss:$0 sm:$0xff] }
   0xb   :  { %373 = vmatpush.bf16.msrb.mxu0 %v1421_v0  ;;  %72 = vst [vmem:[#allocation1 + $0x3] ss:$9 sm:$0xff] %v52_v7  ;;  %302 = vmatpush.bf16.msra.mxu3 %v1420_v4  ;;  %s1598_s3 = smov 32  }
   0xc   :  { %75 = vst [vmem:[#allocation1 + $0x4] ss:$9 sm:$0xff] %v53_v8 }
   0xd   :  { %78 = vst [vmem:[#allocation1 + $0x5] ss:$9 sm:$0xff] %v54_v9  ;;  %158 = vmatmul.bf16.vlgmr.msra.gmra.mxu1 %v1597_v12 }
   0xe   :  { %445 = vmatpush.bf16.msrb.mxu1 %v1421_v0  ;;  %517 = vmatpush.bf16.msrb.mxu2 %v1421_v0  ;;  %81 = vst [vmem:[#allocation1 + $0x6] ss:$9 sm:$0xff] %v55_v10 }
   0xf   :  { %374 = vmatpush.bf16.msrb.mxu0 %v1420_v4  ;;  %589 = vmatpush.bf16.msrb.mxu3 %v1421_v0  ;;  %84 = vst [vmem:[#allocation1 + $0x7] ss:$9 sm:$0xff] %v56_v11 }
  0x12   :  { %446 = vmatpush.bf16.msrb.mxu1 %v1420_v4  ;;  %518 = vmatpush.bf16.msrb.mxu2 %v1420_v4 }
  0x13   :  { %590 = vmatpush.bf16.msrb.mxu3 %v1420_v4 }
  0x16   :  { %v85_v13 = vld [vmem:[#allocation1] sm:$0xff] }
  0x17   :  { %1355 = vmatmul.msk.bf16.vlgmr.msra.gmra.mxu0 %vm86_vm1, %v85_v13 }
  0x18   :  { %661 = vmatpush.bf16.msra.mxu0 %v1421_v0 }
  0x1c   :  { %662 = vmatpush.bf16.msra.mxu0 %v1420_v4 }
  0x8a   :  { %v159_v14 = vpop.f32.mrf.mxu1 }
  0x92   :  { %v161_v16 = vpop.f32.mrf.mxu1 }
  0x94   :  { %v102_v17 = vpop.f32.mrf.mxu0 }
  0x95   :  { %v103_v18 = vadd.f32 %v1433_v15, %v102_v17 }
  0x97   :  { %v109_v19 = vrot.slane %v103_v18, 2  ;;  %v110_v20 = vrot.slane %v103_v18, 4  ;;  %v111_v21 = vrot.slane %v103_v18, 6  ;;  %121 = vst [vmem:[#allocation2] sm:$0x3] %v103_v18 }
  0x99   :  { %122 = vst [vmem:[#allocation2 + $0x2] sm:$0x3] %v109_v19 }
  0x9a   :  { %123 = vst [vmem:[#allocation2 + $0x4] sm:$0x3] %v110_v20 }
  0x9b   :  { %124 = vst [vmem:[#allocation2 + $0x6] sm:$0x3] %v111_v21 }
  0x9c   :  { %v104_v22 = vpop.f32.mrf.mxu0 }
  0x9d   :  { %v105_v23 = vadd.f32 %v1433_v15, %v104_v22 }
  0x9e   :  { %v133_v24 = vld [vmem:[#allocation2] sm:$0x3] }
  0x9f   :  { %v163_v25 = vadd.f32 %v159_v14, %v133_v24  ;;  %v112_v26 = vrot.slane %v105_v23, 2  ;;  %v113_v27 = vrot.slane %v105_v23, 4  ;;  %v114_v28 = vrot.slane %v105_v23, 6  ;;  %125 = vst [vmem:[#allocation2 + $0x8] sm:$0x3] %v105_v23 }
  0xa0   :  { %v215_v55 = vld [vmem:[#allocation2 + $0x2] sm:$0x3] }
  0xa1   :  { %126 = vst [vmem:[#allocation2 + $0xa] sm:$0x3] %v112_v26  ;;  %1436 = vtanh.f32 %v163_v25  ;;  %v1364_v30 = vmul.f32 -1.442695, %v163_v25  ;;  %v287_v22 = vld [vmem:[#allocation2 + $0x4] sm:$0x3] }
  0xa2   :  { %127 = vst [vmem:[#allocation2 + $0xc] sm:$0x3] %v113_v27 }
  0xa3   :  { %128 = vst [vmem:[#allocation2 + $0xe] sm:$0x3] %v114_v28  ;;  %1438 = vpow2.f32 %v1364_v30 }
  0xa7   :  { %v1437_v29 = vpop.eup %1436 }
  0xa8   :  { %186 = vrot.lane.b32.xlu0 %v1437_v29, %s1595_s14 }
  0xa9   :  { %v1439_v31 = vpop.eup %1438 }
  0xaa   :  { %v167_v32 = vadd.f32 1.0, %v1439_v31 }
  0xac   :  { %1440 = vrcp.f32 %v167_v32  ;;  %v179_v38 = vand.u32 2147483648, %v167_v32  ;;  %vm173_vm3 = vweird.f32 %v167_v32  ;;  %v177_v39 = vand.u32 2147483647, %v167_v32 }
  0xae   :  { %v180_v41 = vor.u32 1.1754944e-38, %v179_v38  ;;  %vm178_vm5 = vcmp.eq.f32.partialorder %v177_v39, 8.507059e+37 }
  0xb2   :  { %v1441_v33 = vpop.eup %1440 }
  0xb3   :  { %v169_v34 = vmul.f32 %v1441_v33, %v167_v32  ;;  %vm174_vm2 = vweird.f32 %v1441_v33 }
  0xb4   :  { %vm175_vm4 = vmor %vm173_vm3, %vm174_vm2 }
  0xb5   :  { %v170_v35 = vsub.f32 1.0, %v169_v34 }
  0xb7   :  { %v171_v36 = vmul.f32 %v1441_v33, %v170_v35 }
  0xb9   :  { %v172_v37 = vadd.f32 %v1441_v33, %v171_v36 }
  0xbb   :  { %v176_v40 = vsel %vm175_vm4, %v1441_v33, %v172_v37 }
  0xbc   :  { %v181_v43 = vsel %vm178_vm5, %v180_v41, %v176_v40 }
  0xbd   :  { %v184_v45 = vmul.f32 0.0, %v181_v43 }
 0x11a   :  { %v187_v42 = vpop.permute.xlu0 %186 }
 0x11b   :  { %v189_v44 = vmul.f32 %v187_v42, %v181_v43 }
 0x11d   :  { %191 = vrot.lane.b32.xlu0 %v189_v44, %s1598_s3 }
 0x18f   :  { %v192_v46 = vpop.permute.xlu0 %191 }
 0x190   :  { %v194_v47 = vadd.f32 %v192_v46, %v184_v45 }
 0x192   :  { %1442 = vtanh.f32 %v194_v47 }
 0x198   :  { %v1443_v48 = vpop.eup %1442 }
 0x199   :  { %197 = vrot.lane.b32.xlu1 %v1443_v48, %s1595_s14 }
 0x20b   :  { %v198_v49 = vpop.permute.xlu1 %197 }
 0x20c   :  { %v200_v50 = vmul.f32 %v198_v49, %v181_v43 }
 0x20e   :  { %v1694_v51 = vpack.c.bf16 %v200_v50, %v200_v50 }
 0x210   :  { %v216_v52 = vunpack.c.l.b16 %v1694_v51 }
 0x212   :  { %v217_v53 = vpack.c.b16 %v216_v52, %v216_v52 }
 0x214   :  { %218 = vrot.lane.b32.xlu1 %v217_v53, %s1598_s3  ;;  %v359_v53 = vld [vmem:[#allocation2 + $0x6] sm:$0x3] }
 0x286   :  { %v219_v54 = vpop.permute.xlu1 %218 }
 0x287   :  { %1365 = vmatmul.msk.bf16.vlgmr.msra.gmra.mxu2 %vm146_vm6, %v219_v54 }
 0x30a   :  { %v232_v56 = vpop.f32.mrf.mxu2 }
 0x30b   :  { %v236_v57 = vadd.f32 %v232_v56, %v215_v55 }
 0x30d   :  { %1444 = vtanh.f32 %v236_v57  ;;  %v1366_v60 = vmul.f32 -1.442695, %v236_v57 }
 0x30f   :  { %1446 = vpow2.f32 %v1366_v60 }
 0x312   :  { %v234_v58 = vpop.f32.mrf.mxu2 }
 0x313   :  { %v1445_v59 = vpop.eup %1444 }
 0x314   :  { %259 = vrot.lane.b32.xlu2 %v1445_v59, %s1595_s14 }
 0x315   :  { %v1447_v61 = vpop.eup %1446 }
 0x316   :  { %v240_v62 = vadd.f32 1.0, %v1447_v61 }
 0x318   :  { %1448 = vrcp.f32 %v240_v62  ;;  %v252_v4 = vand.u32 2147483648, %v240_v62  ;;  %vm246_vm8 = vweird.f32 %v240_v62  ;;  %v250_v5 = vand.u32 2147483647, %v240_v62 }
 0x31a   :  { %v253_v7 = vor.u32 1.1754944e-38, %v252_v4  ;;  %vm251_vm10 = vcmp.eq.f32.partialorder %v250_v5, 8.507059e+37 }
 0x31e   :  { %v1449_v63 = vpop.eup %1448 }
 0x31f   :  { %v242_v0 = vmul.f32 %v1449_v63, %v240_v62  ;;  %vm247_vm7 = vweird.f32 %v1449_v63 }
 0x320   :  { %vm248_vm9 = vmor %vm246_vm8, %vm247_vm7 }
 0x321   :  { %v243_v1 = vsub.f32 1.0, %v242_v0 }
 0x323   :  { %v244_v2 = vmul.f32 %v1449_v63, %v243_v1 }
 0x325   :  { %v245_v3 = vadd.f32 %v1449_v63, %v244_v2 }
 0x327   :  { %v249_v6 = vsel %vm248_vm9, %v1449_v63, %v245_v3 }
 0x328   :  { %v254_v9 = vsel %vm251_vm10, %v253_v7, %v249_v6 }
 0x329   :  { %v257_v11 = vmul.f32 %v254_v9, %v194_v47 }
 0x36e   :  { %v260_v8 = vpop.permute.xlu2 %259 }
 0x36f   :  { %v262_v10 = vmul.f32 %v260_v8, %v254_v9 }
 0x371   :  { %264 = vrot.lane.b32.xlu2 %v262_v10, %s1598_s3 }
 0x3cb   :  { %v265_v13 = vpop.permute.xlu2 %264 }
 0x3cc   :  { %v267_v14 = vadd.f32 %v265_v13, %v257_v11 }
 0x3ce   :  { %1450 = vtanh.f32 %v267_v14 }
 0x3d4   :  { %v1451_v15 = vpop.eup %1450 }
 0x3d5   :  { %270 = vrot.lane.b32.xlu0 %v1451_v15, %s1595_s14 }
 0x447   :  { %v271_v16 = vpop.permute.xlu0 %270 }
 0x448   :  { %v273_v17 = vmul.f32 %v271_v16, %v254_v9 }
 0x44a   :  { %v1702_v18 = vpack.c.bf16 %v273_v17, %v273_v17 }
 0x44c   :  { %v288_v19 = vunpack.c.l.b16 %v1702_v18 }
 0x44e   :  { %v289_v20 = vpack.c.b16 %v288_v19, %v288_v19 }
 0x450   :  { %290 = vrot.lane.b32.xlu1 %v289_v20, %s1598_s3 }
 0x4c2   :  { %v291_v21 = vpop.permute.xlu1 %290 }
 0x4c3   :  { %1367 = vmatmul.msk.bf16.vlgmr.msra.gmra.mxu3 %vm146_vm6, %v291_v21  ;;  %v431_v21 = vld [vmem:[#allocation2 + $0x8] sm:$0x3] }
 0x546   :  { %v304_v23 = vpop.f32.mrf.mxu3 }
 0x547   :  { %v308_v24 = vadd.f32 %v304_v23, %v287_v22 }
 0x549   :  { %1452 = vtanh.f32 %v308_v24  ;;  %v1368_v27 = vmul.f32 -1.442695, %v308_v24 }
 0x54b   :  { %1454 = vpow2.f32 %v1368_v27 }
 0x54e   :  { %v306_v25 = vpop.f32.mrf.mxu3 }
 0x54f   :  { %v1453_v26 = vpop.eup %1452 }
 0x550   :  { %331 = vrot.lane.b32.xlu2 %v1453_v26, %s1595_s14 }
 0x551   :  { %v1455_v28 = vpop.eup %1454 }
 0x552   :  { %v312_v29 = vadd.f32 1.0, %v1455_v28 }
 0x554   :  { %1456 = vrcp.f32 %v312_v29  ;;  %v324_v35 = vand.u32 2147483648, %v312_v29  ;;  %vm318_vm12 = vweird.f32 %v312_v29  ;;  %v322_v36 = vand.u32 2147483647, %v312_v29 }
 0x556   :  { %v325_v38 = vor.u32 1.1754944e-38, %v324_v35  ;;  %vm323_vm14 = vcmp.eq.f32.partialorder %v322_v36, 8.507059e+37 }
 0x55a   :  { %v1457_v30 = vpop.eup %1456 }
 0x55b   :  { %v314_v31 = vmul.f32 %v1457_v30, %v312_v29  ;;  %vm319_vm11 = vweird.f32 %v1457_v30 }
 0x55c   :  { %vm320_vm13 = vmor %vm318_vm12, %vm319_vm11 }
 0x55d   :  { %v315_v32 = vsub.f32 1.0, %v314_v31 }
 0x55f   :  { %v316_v33 = vmul.f32 %v1457_v30, %v315_v32 }
 0x561   :  { %v317_v34 = vadd.f32 %v1457_v30, %v316_v33 }
 0x563   :  { %v321_v37 = vsel %vm320_vm13, %v1457_v30, %v317_v34 }
 0x564   :  { %v326_v40 = vsel %vm323_vm14, %v325_v38, %v321_v37 }
 0x565   :  { %v329_v42 = vmul.f32 %v326_v40, %v267_v14 }
 0x5aa   :  { %v332_v39 = vpop.permute.xlu2 %331 }
 0x5ab   :  { %v334_v41 = vmul.f32 %v332_v39, %v326_v40 }
 0x5ad   :  { %336 = vrot.lane.b32.xlu0 %v334_v41, %s1598_s3 }
 0x61f   :  { %v337_v43 = vpop.permute.xlu0 %336 }
 0x620   :  { %v339_v44 = vadd.f32 %v337_v43, %v329_v42 }
 0x622   :  { %1458 = vtanh.f32 %v339_v44 }
 0x628   :  { %v1459_v45 = vpop.eup %1458 }
 0x629   :  { %342 = vrot.lane.b32.xlu1 %v1459_v45, %s1595_s14 }
 0x69b   :  { %v343_v46 = vpop.permute.xlu1 %342 }
 0x69c   :  { %v345_v47 = vmul.f32 %v343_v46, %v326_v40 }
 0x69e   :  { %v1710_v48 = vpack.c.bf16 %v345_v47, %v345_v47 }
 0x6a0   :  { %v360_v49 = vunpack.c.l.b16 %v1710_v48 }
 0x6a2   :  { %v361_v50 = vpack.c.b16 %v360_v49, %v360_v49 }
 0x6a4   :  { %362 = vrot.lane.b32.xlu2 %v361_v50, %s1598_s3 }
 0x6fe   :  { %v363_v52 = vpop.permute.xlu2 %362 }
 0x6ff   :  { %1369 = vmatmul.msk.bf16.vlgmr.msrb.gmra.mxu0 %vm146_vm6, %v363_v52 }
 0x77c   :  { %v376_v54 = vpop.f32.mrf.mxu0 }
 0x77d   :  { %v380_v55 = vadd.f32 %v376_v54, %v359_v53  ;;  %v503_v53 = vld [vmem:[#allocation2 + $0xa] sm:$0x3] }
 0x77f   :  { %1460 = vtanh.f32 %v380_v55  ;;  %v1370_v58 = vmul.f32 -1.442695, %v380_v55 }
 0x781   :  { %1462 = vpow2.f32 %v1370_v58 }
 0x784   :  { %v378_v56 = vpop.f32.mrf.mxu0 }
 0x785   :  { %v1461_v57 = vpop.eup %1460 }
 0x786   :  { %403 = vrot.lane.b32.xlu0 %v1461_v57, %s1595_s14 }
 0x787   :  { %v1463_v59 = vpop.eup %1462 }
 0x788   :  { %v384_v60 = vadd.f32 1.0, %v1463_v59 }
 0x78a   :  { %1464 = vrcp.f32 %v384_v60  ;;  %v396_v2 = vand.u32 2147483648, %v384_v60  ;;  %vm390_vm0 = vweird.f32 %v384_v60  ;;  %v394_v3 = vand.u32 2147483647, %v384_v60 }
 0x78c   :  { %v397_v5 = vor.u32 1.1754944e-38, %v396_v2  ;;  %vm395_vm2 = vcmp.eq.f32.partialorder %v394_v3, 8.507059e+37 }
 0x790   :  { %v1465_v61 = vpop.eup %1464 }
 0x791   :  { %v386_v62 = vmul.f32 %v1465_v61, %v384_v60  ;;  %vm391_vm15 = vweird.f32 %v1465_v61 }
 0x792   :  { %vm392_vm1 = vmor %vm390_vm0, %vm391_vm15  ;;  %vm204_vm0 = vcmask 1040384  }
 0x793   :  { %v387_v63 = vsub.f32 1.0, %v386_v62 }
 0x795   :  { %v388_v0 = vmul.f32 %v1465_v61, %v387_v63 }
 0x797   :  { %v389_v1 = vadd.f32 %v1465_v61, %v388_v0 }
 0x799   :  { %v393_v4 = vsel %vm392_vm1, %v1465_v61, %v389_v1 }
 0x79a   :  { %v398_v7 = vsel %vm395_vm2, %v397_v5, %v393_v4 }
 0x79b   :  { %v401_v9 = vmul.f32 %v398_v7, %v339_v44 }
 0x7f8   :  { %v404_v6 = vpop.permute.xlu0 %403 }
 0x7f9   :  { %v406_v8 = vmul.f32 %v404_v6, %v398_v7 }
 0x7fb   :  { %408 = vrot.lane.b32.xlu1 %v406_v8, %s1598_s3 }
 0x86d   :  { %v409_v10 = vpop.permute.xlu1 %408 }
 0x86e   :  { %v411_v11 = vadd.f32 %v409_v10, %v401_v9 }
 0x870   :  { %1466 = vtanh.f32 %v411_v11 }
 0x876   :  { %v1467_v13 = vpop.eup %1466 }
 0x877   :  { %414 = vrot.lane.b32.xlu2 %v1467_v13, %s1595_s14 }
 0x8d1   :  { %v415_v14 = vpop.permute.xlu2 %414 }
 0x8d2   :  { %v417_v15 = vmul.f32 %v415_v14, %v398_v7 }
 0x8d4   :  { %v1718_v16 = vpack.c.bf16 %v417_v15, %v417_v15 }
 0x8d6   :  { %v432_v17 = vunpack.c.l.b16 %v1718_v16 }
 0x8d8   :  { %v433_v19 = vpack.c.b16 %v432_v17, %v432_v17 }
 0x8da   :  { %434 = vrot.lane.b32.xlu0 %v433_v19, %s1598_s3 }
 0x94c   :  { %v435_v20 = vpop.permute.xlu0 %434 }
 0x94d   :  { %1371 = vmatmul.msk.bf16.vlgmr.msrb.gmra.mxu1 %vm146_vm6, %v435_v20 }
 0x9ca   :  { %v448_v22 = vpop.f32.mrf.mxu1 }
 0x9cb   :  { %v452_v23 = vadd.f32 %v448_v22, %v431_v21  ;;  %v575_v22 = vld [vmem:[#allocation2 + $0xc] sm:$0x3] }
 0x9cd   :  { %1468 = vtanh.f32 %v452_v23  ;;  %v1372_v26 = vmul.f32 -1.442695, %v452_v23 }
 0x9cf   :  { %1470 = vpow2.f32 %v1372_v26 }
 0x9d2   :  { %v450_v24 = vpop.f32.mrf.mxu1 }
 0x9d3   :  { %v1469_v25 = vpop.eup %1468 }
 0x9d4   :  { %475 = vrot.lane.b32.xlu1 %v1469_v25, %s1595_s14 }
 0x9d5   :  { %v1471_v27 = vpop.eup %1470 }
 0x9d6   :  { %v456_v28 = vadd.f32 1.0, %v1471_v27 }
 0x9d8   :  { %1472 = vrcp.f32 %v456_v28  ;;  %v468_v34 = vand.u32 2147483648, %v456_v28  ;;  %vm462_vm4 = vweird.f32 %v456_v28  ;;  %v466_v35 = vand.u32 2147483647, %v456_v28 }
 0x9da   :  { %v469_v37 = vor.u32 1.1754944e-38, %v468_v34  ;;  %vm467_vm7 = vcmp.eq.f32.partialorder %v466_v35, 8.507059e+37 }
 0x9de   :  { %v1473_v29 = vpop.eup %1472 }
 0x9df   :  { %v458_v30 = vmul.f32 %v1473_v29, %v456_v28  ;;  %vm463_vm3 = vweird.f32 %v1473_v29 }
 0x9e0   :  { %vm464_vm5 = vmor %vm462_vm4, %vm463_vm3 }
 0x9e1   :  { %v459_v31 = vsub.f32 1.0, %v458_v30 }
 0x9e3   :  { %v460_v32 = vmul.f32 %v1473_v29, %v459_v31 }
 0x9e5   :  { %v461_v33 = vadd.f32 %v1473_v29, %v460_v32 }
 0x9e7   :  { %v465_v36 = vsel %vm464_vm5, %v1473_v29, %v461_v33  ;;  %vm212_vm5 = vcmask 253952  }
 0x9e8   :  { %v470_v39 = vsel %vm467_vm7, %v469_v37, %v465_v36 }
 0x9e9   :  { %v473_v41 = vmul.f32 %v470_v39, %v411_v11 }
 0xa46   :  { %v476_v38 = vpop.permute.xlu1 %475 }
 0xa47   :  { %v478_v40 = vmul.f32 %v476_v38, %v470_v39 }
 0xa49   :  { %480 = vrot.lane.b32.xlu2 %v478_v40, %s1598_s3 }
 0xaa3   :  { %v481_v42 = vpop.permute.xlu2 %480 }
 0xaa4   :  { %v483_v43 = vadd.f32 %v481_v42, %v473_v41 }
 0xaa6   :  { %1474 = vtanh.f32 %v483_v43 }
 0xaac   :  { %v1475_v44 = vpop.eup %1474 }
 0xaad   :  { %486 = vrot.lane.b32.xlu0 %v1475_v44, %s1595_s14 }
 0xb1f   :  { %v487_v45 = vpop.permute.xlu0 %486 }
 0xb20   :  { %v489_v46 = vmul.f32 %v487_v45, %v470_v39 }
 0xb22   :  { %v1726_v47 = vpack.c.bf16 %v489_v46, %v489_v46 }
 0xb24   :  { %v504_v49 = vunpack.c.l.b16 %v1726_v47 }
 0xb26   :  { %v505_v50 = vpack.c.b16 %v504_v49, %v504_v49 }
 0xb28   :  { %506 = vrot.lane.b32.xlu1 %v505_v50, %s1598_s3 }
 0xb9a   :  { %v507_v52 = vpop.permute.xlu1 %506 }
 0xb9b   :  { %1373 = vmatmul.msk.bf16.vlgmr.msrb.gmra.mxu2 %vm146_vm6, %v507_v52 }
 0xc1e   :  { %v520_v54 = vpop.f32.mrf.mxu2 }
 0xc1f   :  { %v524_v55 = vadd.f32 %v520_v54, %v503_v53 }
 0xc21   :  { %1476 = vtanh.f32 %v524_v55  ;;  %v1374_v58 = vmul.f32 -1.442695, %v524_v55  ;;  %v647_v55 = vld [vmem:[#allocation2 + $0xe] sm:$0x3] }
 0xc23   :  { %1478 = vpow2.f32 %v1374_v58 }
 0xc26   :  { %v522_v56 = vpop.f32.mrf.mxu2 }
 0xc27   :  { %v1477_v57 = vpop.eup %1476 }
 0xc28   :  { %547 = vrot.lane.b32.xlu2 %v1477_v57, %s1595_s14 }
 0xc29   :  { %v1479_v59 = vpop.eup %1478 }
 0xc2a   :  { %v528_v60 = vadd.f32 1.0, %v1479_v59 }
 0xc2c   :  { %1480 = vrcp.f32 %v528_v60  ;;  %v540_v2 = vand.u32 2147483648, %v528_v60  ;;  %vm534_vm9 = vweird.f32 %v528_v60  ;;  %v538_v3 = vand.u32 2147483647, %v528_v60 }
 0xc2e   :  { %v541_v5 = vor.u32 1.1754944e-38, %v540_v2  ;;  %vm539_vm11 = vcmp.eq.f32.partialorder %v538_v3, 8.507059e+37 }
 0xc32   :  { %v1481_v61 = vpop.eup %1480 }
 0xc33   :  { %v530_v62 = vmul.f32 %v1481_v61, %v528_v60  ;;  %vm535_vm8 = vweird.f32 %v1481_v61  ;;  %v203_v60 = vrot.slane %v1694_v51, 3 }
 0xc34   :  { %vm536_vm10 = vmor %vm534_vm9, %vm535_vm8 }
 0xc35   :  { %v531_v63 = vsub.f32 1.0, %v530_v62  ;;  %v420_v62 = vrot.slane %v1718_v16, 3 }
 0xc37   :  { %v532_v0 = vmul.f32 %v1481_v61, %v531_v63  ;;  %v423_v63 = vsel %vm204_vm0, %v1718_v16, %v420_v62 }
 0xc39   :  { %v533_v1 = vadd.f32 %v1481_v61, %v532_v0 }
 0xc3b   :  { %v537_v4 = vsel %vm536_vm10, %v1481_v61, %v533_v1  ;;  %v207_v61 = vsel %vm204_vm0, %v1694_v51, %v203_v60 }
 0xc3c   :  { %v542_v7 = vsel %vm539_vm11, %v541_v5, %v537_v4 }
 0xc3d   :  { %v545_v9 = vmul.f32 %v542_v7, %v483_v43 }
 0xc82   :  { %v548_v6 = vpop.permute.xlu2 %547 }
 0xc83   :  { %v550_v8 = vmul.f32 %v548_v6, %v542_v7 }
 0xc85   :  { %552 = vrot.lane.b32.xlu0 %v550_v8, %s1598_s3 }
 0xcf7   :  { %v553_v10 = vpop.permute.xlu0 %552 }
 0xcf8   :  { %v555_v11 = vadd.f32 %v553_v10, %v545_v9 }
 0xcfa   :  { %1482 = vtanh.f32 %v555_v11 }
 0xd00   :  { %v1483_v13 = vpop.eup %1482 }
 0xd01   :  { %558 = vrot.lane.b32.xlu1 %v1483_v13, %s1595_s14 }
 0xd73   :  { %v559_v14 = vpop.permute.xlu1 %558 }
 0xd74   :  { %v561_v15 = vmul.f32 %v559_v14, %v542_v7 }
 0xd76   :  { %v1734_v17 = vpack.c.bf16 %v561_v15, %v561_v15 }
 0xd78   :  { %v576_v19 = vunpack.c.l.b16 %v1734_v17 }
 0xd7a   :  { %v577_v20 = vpack.c.b16 %v576_v19, %v576_v19  ;;  %v276_v19 = vrot.slane %v1702_v18, 3 }
 0xd7c   :  { %578 = vrot.lane.b32.xlu2 %v577_v20, %s1598_s3 }
 0xdd6   :  { %v579_v21 = vpop.permute.xlu2 %578 }
 0xdd7   :  { %1375 = vmatmul.msk.bf16.vlgmr.msrb.gmra.mxu3 %vm146_vm6, %v579_v21  ;;  %v279_v21 = vsel %vm204_vm0, %v1702_v18, %v276_v19 }
 0xe5a   :  { %v592_v23 = vpop.f32.mrf.mxu3 }
 0xe5b   :  { %v596_v24 = vadd.f32 %v592_v23, %v575_v22  ;;  %v492_v22 = vrot.slane %v1726_v47, 3 }
 0xe5d   :  { %1484 = vtanh.f32 %v596_v24  ;;  %v1376_v27 = vmul.f32 -1.442695, %v596_v24 }
 0xe5f   :  { %1486 = vpow2.f32 %v1376_v27 }
 0xe62   :  { %v594_v25 = vpop.f32.mrf.mxu3 }
 0xe63   :  { %v1485_v26 = vpop.eup %1484  ;;  %v495_v25 = vsel %vm204_vm0, %v1726_v47, %v492_v22  ;;  %v348_v47 = vrot.slane %v1710_v48, 3 }
 0xe64   :  { %619 = vrot.lane.b32.xlu0 %v1485_v26, %s1595_s14 }
 0xe65   :  { %v1487_v28 = vpop.eup %1486 }
 0xe66   :  { %v600_v29 = vadd.f32 1.0, %v1487_v28 }
 0xe68   :  { %1488 = vrcp.f32 %v600_v29  ;;  %v612_v35 = vand.u32 2147483648, %v600_v29  ;;  %vm606_vm13 = vweird.f32 %v600_v29  ;;  %v610_v36 = vand.u32 2147483647, %v600_v29 }
 0xe6a   :  { %v613_v38 = vor.u32 1.1754944e-38, %v612_v35  ;;  %vm611_vm15 = vcmp.eq.f32.partialorder %v610_v36, 8.507059e+37  ;;  %v351_v35 = vsel %vm204_vm0, %v1710_v48, %v348_v47  ;;  %v564_v36 = vrot.slane %v1734_v17, 3 }
 0xe6e   :  { %v1489_v30 = vpop.eup %1488 }
 0xe6f   :  { %v602_v31 = vmul.f32 %v1489_v30, %v600_v29  ;;  %vm607_vm12 = vweird.f32 %v1489_v30 }
 0xe70   :  { %vm608_vm14 = vmor %vm606_vm13, %vm607_vm12 }
 0xe71   :  { %v603_v32 = vsub.f32 1.0, %v602_v31 }
 0xe73   :  { %v604_v33 = vmul.f32 %v1489_v30, %v603_v32 }
 0xe75   :  { %v605_v34 = vadd.f32 %v1489_v30, %v604_v33 }
 0xe77   :  { %v609_v37 = vsel %vm608_vm14, %v1489_v30, %v605_v34 }
 0xe78   :  { %v614_v40 = vsel %vm611_vm15, %v613_v38, %v609_v37  ;;  %v567_v38 = vsel %vm204_vm0, %v1734_v17, %v564_v36 }
 0xe79   :  { %v617_v42 = vmul.f32 %v614_v40, %v555_v11 }
 0xed6   :  { %v620_v39 = vpop.permute.xlu0 %619 }
 0xed7   :  { %v622_v41 = vmul.f32 %v620_v39, %v614_v40 }
 0xed9   :  { %624 = vrot.lane.b32.xlu1 %v622_v41, %s1598_s3 }
 0xf4b   :  { %v625_v43 = vpop.permute.xlu1 %624 }
 0xf4c   :  { %v1741_v44 = vadd.f32 %v625_v43, %v617_v42 }
 0xf4e   :  { %1490 = vtanh.f32 %v1741_v44 }
 0xf54   :  { %v1491_v45 = vpop.eup %1490 }
 0xf55   :  { %630 = vrot.lane.b32.xlu2 %v1491_v45, %s1595_s14 }
 0xfaf   :  { %v631_v46 = vpop.permute.xlu2 %630 }
 0xfb0   :  { %v633_v49 = vmul.f32 %v631_v46, %v614_v40  ;;  %v1425_v46 = vld [vmem:[#allocation4 + $0x8] sm:$0xff] }
 0xfb1   :  { %831 = vmatpush.bf16.msra.mxu2 %v1425_v46  ;;  %890 = vmatpush.bf16.msra.mxu3 %v1425_v46 }
 0xfb2   :  { %v634_v50 = vpack.c.bf16 %v633_v49, %v633_v49  ;;  %v1423_v49 = vld [vmem:[%s1860_s4 + $0x8] sm:$0xff]  ;;  %949 = vmatpush.bf16.msrb.mxu0 %v1425_v46 }
 0xfb3   :  { %778 = vmatpush.bf16.msra.mxu1 %v1423_v49 }
 0xfb4   :  { %v648_v52 = vunpack.c.l.b16 %v634_v50  ;;  %v636_v0 = vrot.slane %v634_v50, 3 }
 0xfb6   :  { %v649_v53 = vpack.c.b16 %v648_v52, %v648_v52  ;;  %v639_v1 = vsel %vm204_vm0, %v634_v50, %v636_v0  ;;  %v1424_v50 = vld [vmem:[#allocation4] sm:$0xff] }
 0xfb7   :  { %v1422_v52 = vld [vmem:[%s1860_s4] sm:$0xff]  ;;  %832 = vmatpush.bf16.msra.mxu2 %v1424_v50  ;;  %891 = vmatpush.bf16.msra.mxu3 %v1424_v50 }
 0xfb8   :  { %650 = vrot.lane.b32.xlu0 %v649_v53, %s1598_s3  ;;  %950 = vmatpush.bf16.msrb.mxu0 %v1424_v50 }
 0xfb9   :  { %779 = vmatpush.bf16.msra.mxu1 %v1422_v52 }
 0xfba   :  { %833 = vmatmul.bf16.vlgmr.msra.gmra.mxu2 %v1597_v12  ;;  %v1434_v12 = vld [vmem:[%s1862_s6] ss:$0 sm:$0xff] }
 0xfbb   :  { %1067 = vmatpush.bf16.msrb.mxu2 %v1425_v46  ;;  %1126 = vmatpush.bf16.msrb.mxu3 %v1425_v46 }
 0xfbd   :  { %1008 = vmatpush.bf16.msrb.mxu1 %v1425_v46 }
 0xfbf   :  { %1068 = vmatpush.bf16.msrb.mxu2 %v1424_v50  ;;  %1127 = vmatpush.bf16.msrb.mxu3 %v1424_v50 }
 0xfc1   :  { %1009 = vmatpush.bf16.msrb.mxu1 %v1424_v50 }
0x102a   :  { %v651_v54 = vpop.permute.xlu0 %650 }
0x102b   :  { %1377 = vmatmul.msk.bf16.vlgmr.msra.gmra.mxu0 %vm146_vm6, %v651_v54 }
0x102c   :  { %1185 = vmatpush.bf16.msra.mxu0 %v1425_v46 }
0x1030   :  { %1186 = vmatpush.bf16.msra.mxu0 %v1424_v50 }
0x10a8   :  { %v664_v56 = vpop.f32.mrf.mxu0 }
0x10a9   :  { %v668_v57 = vadd.f32 %v664_v56, %v647_v55  ;;  %v834_v56 = vpop.f32.mrf.mxu2 }
0x10ab   :  { %1492 = vtanh.f32 %v668_v57  ;;  %v1378_v2 = vmul.f32 -1.442695, %v668_v57 }
0x10ad   :  { %1494 = vpow2.f32 %v1378_v2 }
0x10b0   :  { %v666_v58 = vpop.f32.mrf.mxu0 }
0x10b1   :  { %v1493_v59 = vpop.eup %1492  ;;  %v836_v57 = vpop.f32.mrf.mxu2 }
0x10b2   :  { %691 = vrot.lane.b32.xlu1 %v1493_v59, %s1595_s14 }
0x10b3   :  { %v1495_v3 = vpop.eup %1494 }
0x10b4   :  { %v672_v4 = vadd.f32 1.0, %v1495_v3 }
0x10b6   :  { %1496 = vrcp.f32 %v672_v4  ;;  %v684_v9 = vand.u32 2147483648, %v672_v4  ;;  %vm678_vm2 = vweird.f32 %v672_v4  ;;  %v682_v16 = vand.u32 2147483647, %v672_v4 }
0x10b8   :  { %v685_v11 = vor.u32 1.1754944e-38, %v684_v9  ;;  %vm683_vm4 = vcmp.eq.f32.partialorder %v682_v16, 8.507059e+37 }
0x10ba   :  { %209 = vrot.lane.b32.xlu1 %v207_v61, %s1598_s3 }
0x10bc   :  { %v1497_v51 = vpop.eup %1496 }
0x10bd   :  { %v674_v5 = vmul.f32 %v1497_v51, %v672_v4  ;;  %vm679_vm1 = vweird.f32 %v1497_v51 }
0x10be   :  { %vm680_vm3 = vmor %vm678_vm2, %vm679_vm1 }
0x10bf   :  { %v675_v6 = vsub.f32 1.0, %v674_v5 }
0x10c1   :  { %v676_v7 = vmul.f32 %v1497_v51, %v675_v6 }
0x10c2   :  { %425 = vrot.lane.b32.xlu1 %v423_v63, %s1598_s3 }
0x10c3   :  { %v677_v8 = vadd.f32 %v1497_v51, %v676_v7 }
0x10c5   :  { %v681_v10 = vsel %vm680_vm3, %v1497_v51, %v677_v8 }
0x10c6   :  { %v686_v14 = vsel %vm683_vm4, %v685_v11, %v681_v10 }
0x10c7   :  { %v689_v28 = vmul.f32 %v686_v14, %v1741_v44 }
0x10ca   :  { %641 = vrot.lane.b32.xlu1 %v639_v1, %s1598_s3 }
0x1124   :  { %v692_v13 = vpop.permute.xlu1 %691 }
0x1125   :  { %v694_v15 = vmul.f32 %v692_v13, %v686_v14 }
0x1127   :  { %696 = vrot.lane.b32.xlu2 %v694_v15, %s1598_s3 }
0x112c   :  { %v210_v20 = vpop.permute.xlu1 %209 }
0x112d   :  { %213 = vst.msk [vmem:[#allocation3] sm:$0x1] %vm212_vm5, %v210_v20 }
0x112f   :  { %281 = vrot.lane.b32.xlu2 %v279_v21, %s1598_s3 }
0x1134   :  { %v718_v23 = vld [vmem:[#allocation3] sm:$0x1]  ;;  %v426_v24 = vpop.permute.xlu1 %425 }
0x1135   :  { %735 = vst [vmem:[#allocation1] ss:$9 sm:$0xff] %v718_v23 }
0x1136   :  { %429 = vst.msk [vmem:[#allocation3 + $0x3] sm:$0x1] %vm212_vm5, %v426_v24 }
0x1137   :  { %497 = vrot.lane.b32.xlu2 %v495_v25, %s1598_s3 }
0x113c   :  { %v642_v26 = vpop.permute.xlu1 %641 }
0x113d   :  { %v721_v27 = vld [vmem:[#allocation3 + $0x3] sm:$0x1]  ;;  %645 = vst.msk [vmem:[#allocation3 + $0x6] sm:$0x1] %vm212_vm5, %v642_v26 }
0x113e   :  { %744 = vst [vmem:[#allocation1 + $0x3] ss:$9 sm:$0xff] %v721_v27 }
0x1144   :  { %v724_v18 = vld [vmem:[#allocation3 + $0x6] sm:$0x1] }
0x1145   :  { %753 = vst [vmem:[#allocation1 + $0x6] ss:$9 sm:$0xff] %v724_v18 }
0x1181   :  { %v697_v29 = vpop.permute.xlu2 %696 }
0x1182   :  { %v699_v30 = vadd.f32 %v697_v29, %v689_v28 }
0x1184   :  { %1498 = vtanh.f32 %v699_v30 }
0x1189   :  { %v282_v31 = vpop.permute.xlu2 %281 }
0x118a   :  { %v1499_v32 = vpop.eup %1498  ;;  %285 = vst.msk [vmem:[#allocation3 + $0x1] sm:$0x1] %vm212_vm5, %v282_v31 }
0x118b   :  { %702 = vrot.lane.b32.xlu0 %v1499_v32, %s1595_s14 }
0x1191   :  { %v719_v33 = vld [vmem:[#allocation3 + $0x1] sm:$0x1]  ;;  %v498_v34 = vpop.permute.xlu2 %497 }
0x1192   :  { %738 = vst [vmem:[#allocation1 + $0x1] ss:$9 sm:$0xff] %v719_v33 }
0x1193   :  { %501 = vst.msk [vmem:[#allocation3 + $0x4] sm:$0x1] %vm212_vm5, %v498_v34  ;;  %353 = vrot.lane.b32.xlu0 %v351_v35, %s1598_s3 }
0x119a   :  { %v722_v37 = vld [vmem:[#allocation3 + $0x4] sm:$0x1] }
0x119b   :  { %747 = vst [vmem:[#allocation1 + $0x4] ss:$9 sm:$0xff] %v722_v37  ;;  %569 = vrot.lane.b32.xlu0 %v567_v38, %s1598_s3 }
0x11fd   :  { %v703_v39 = vpop.permute.xlu0 %702 }
0x11fe   :  { %v705_v40 = vmul.f32 %v703_v39, %v686_v14 }
0x1200   :  { %v706_v41 = vpack.c.bf16 %v705_v40, %v705_v40 }
0x1202   :  { %v708_v42 = vrot.slane %v706_v41, 3 }
0x1204   :  { %v711_v43 = vsel %vm204_vm0, %v706_v41, %v708_v42 }
0x1205   :  { %v354_v48 = vpop.permute.xlu0 %353  ;;  %713 = vrot.lane.b32.xlu2 %v711_v43, %s1598_s3 }
0x1206   :  { %357 = vst.msk [vmem:[#allocation3 + $0x2] sm:$0x1] %vm212_vm5, %v354_v48 }
0x120d   :  { %v720_v44 = vld [vmem:[#allocation3 + $0x2] sm:$0x1]  ;;  %v570_v45 = vpop.permute.xlu0 %569 }
0x120e   :  { %741 = vst [vmem:[#allocation1 + $0x2] ss:$9 sm:$0xff] %v720_v44 }
0x120f   :  { %573 = vst.msk [vmem:[#allocation3 + $0x5] sm:$0x1] %vm212_vm5, %v570_v45 }
0x1216   :  { %v723_v17 = vld [vmem:[#allocation3 + $0x5] sm:$0x1] }
0x1217   :  { %750 = vst [vmem:[#allocation1 + $0x5] ss:$9 sm:$0xff] %v723_v17 }
0x125f   :  { %v714_v53 = vpop.permute.xlu2 %713 }
0x1260   :  { %717 = vst.msk [vmem:[#allocation3 + $0x7] sm:$0x1] %vm212_vm5, %v714_v53 }
0x1267   :  { %v725_v54 = vld [vmem:[#allocation3 + $0x7] sm:$0x1] }
0x1268   :  { %756 = vst [vmem:[#allocation1 + $0x7] ss:$9 sm:$0xff] %v725_v54 }
0x126f   :  { %v757_v55 = vld [vmem:[#allocation1] sm:$0xff] }
0x1270   :  { %1387 = vmatmul.msk.bf16.vlgmr.msra.gmra.mxu1 %vm146_vm6, %v757_v55 }
0x1271   :  { %1244 = vmatpush.bf16.msra.mxu1 %v1425_v46 }
0x1275   :  { %1245 = vmatpush.bf16.msra.mxu1 %v1424_v50 }
0x12ed   :  { %v781_v58 = vpop.f32.mrf.mxu1 }
0x12ee   :  { %v782_v59 = vadd.f32 %v1434_v12, %v781_v58 }
0x12f0   :  { %v788_v60 = vrot.slane %v782_v59, 2  ;;  %v789_v61 = vrot.slane %v782_v59, 4  ;;  %v790_v62 = vrot.slane %v782_v59, 6  ;;  %800 = vst [vmem:[#allocation2] sm:$0x3] %v782_v59 }
0x12f2   :  { %801 = vst [vmem:[#allocation2 + $0x2] sm:$0x3] %v788_v60 }
0x12f3   :  { %802 = vst [vmem:[#allocation2 + $0x4] sm:$0x3] %v789_v61 }
0x12f4   :  { %803 = vst [vmem:[#allocation2 + $0x6] sm:$0x3] %v790_v62 }
0x12f5   :  { %v783_v63 = vpop.f32.mrf.mxu1 }
0x12f6   :  { %v784_v0 = vadd.f32 %v1434_v12, %v783_v63 }
0x12f7   :  { %v812_v1 = vld [vmem:[#allocation2] sm:$0x3] }
0x12f8   :  { %v838_v2 = vadd.f32 %v834_v56, %v812_v1  ;;  %v791_v3 = vrot.slane %v784_v0, 2  ;;  %v792_v4 = vrot.slane %v784_v0, 4  ;;  %v793_v51 = vrot.slane %v784_v0, 6  ;;  %804 = vst [vmem:[#allocation2 + $0x8] sm:$0x3] %v784_v0 }
0x12f9   :  { %v876_v31 = vld [vmem:[#allocation2 + $0x2] sm:$0x3] }
0x12fa   :  { %1500 = vtanh.f32 %v838_v2  ;;  %805 = vst [vmem:[#allocation2 + $0xa] sm:$0x3] %v791_v3  ;;  %v1396_v6 = vmul.f32 -1.442695, %v838_v2  ;;  %v935_v58 = vld [vmem:[#allocation2 + $0x4] sm:$0x3] }
0x12fb   :  { %806 = vst [vmem:[#allocation2 + $0xc] sm:$0x3] %v792_v4 }
0x12fc   :  { %807 = vst [vmem:[#allocation2 + $0xe] sm:$0x3] %v793_v51  ;;  %1502 = vpow2.f32 %v1396_v6 }
0x1300   :  { %v1501_v5 = vpop.eup %1500 }
0x1301   :  { %861 = vrot.lane.b32.xlu0 %v1501_v5, %s1595_s14 }
0x1302   :  { %v1503_v7 = vpop.eup %1502 }
0x1303   :  { %v842_v8 = vadd.f32 1.0, %v1503_v7 }
0x1305   :  { %1504 = vrcp.f32 %v842_v8  ;;  %v854_v14 = vand.u32 2147483648, %v842_v8  ;;  %vm848_vm8 = vweird.f32 %v842_v8  ;;  %v852_v15 = vand.u32 2147483647, %v842_v8 }
0x1307   :  { %v855_v20 = vor.u32 1.1754944e-38, %v854_v14  ;;  %vm853_vm10 = vcmp.eq.f32.partialorder %v852_v15, 8.507059e+37 }
0x130b   :  { %v1505_v9 = vpop.eup %1504 }
0x130c   :  { %v844_v16 = vmul.f32 %v1505_v9, %v842_v8  ;;  %vm849_vm7 = vweird.f32 %v1505_v9 }
0x130d   :  { %vm850_vm9 = vmor %vm848_vm8, %vm849_vm7 }
0x130e   :  { %v845_v10 = vsub.f32 1.0, %v844_v16 }
0x1310   :  { %v846_v11 = vmul.f32 %v1505_v9, %v845_v10 }
0x1312   :  { %v847_v13 = vadd.f32 %v1505_v9, %v846_v11 }
0x1314   :  { %v851_v19 = vsel %vm850_vm9, %v1505_v9, %v847_v13 }
0x1315   :  { %v856_v22 = vsel %vm853_vm10, %v855_v20, %v851_v19 }
0x1316   :  { %v859_v24 = vmul.f32 0.0, %v856_v22 }
0x1373   :  { %v862_v21 = vpop.permute.xlu0 %861 }
0x1374   :  { %v864_v23 = vmul.f32 %v862_v21, %v856_v22 }
0x1376   :  { %866 = vrot.lane.b32.xlu1 %v864_v23, %s1598_s3 }
0x13e8   :  { %v867_v25 = vpop.permute.xlu1 %866 }
0x13e9   :  { %v869_v26 = vadd.f32 %v867_v25, %v859_v24  ;;  %v994_v24 = vld [vmem:[#allocation2 + $0x6] sm:$0x3] }
0x13eb   :  { %1506 = vtanh.f32 %v869_v26 }
0x13f1   :  { %v1507_v27 = vpop.eup %1506 }
0x13f2   :  { %872 = vrot.lane.b32.xlu2 %v1507_v27, %s1595_s14 }
0x144c   :  { %v873_v18 = vpop.permute.xlu2 %872 }
0x144d   :  { %v875_v28 = vmul.f32 %v873_v18, %v856_v22 }
0x144f   :  { %v877_v29 = vpack.c.bf16 %v875_v28, %v875_v28 }
0x1451   :  { %879 = vrot.lane.b32.xlu0 %v877_v29, %s1598_s3 }
0x14c3   :  { %v880_v30 = vpop.permute.xlu0 %879 }
0x14c4   :  { %1397 = vmatmul.msk.bf16.vlgmr.msra.gmra.mxu3 %vm146_vm6, %v880_v30 }
0x1547   :  { %v893_v32 = vpop.f32.mrf.mxu3 }
0x1548   :  { %v897_v47 = vadd.f32 %v893_v32, %v876_v31 }
0x154a   :  { %1508 = vtanh.f32 %v897_v47  ;;  %v1398_v35 = vmul.f32 -1.442695, %v897_v47 }
0x154c   :  { %1510 = vpow2.f32 %v1398_v35 }
0x154f   :  { %v895_v33 = vpop.f32.mrf.mxu3 }
0x1550   :  { %v1509_v34 = vpop.eup %1508 }
0x1551   :  { %920 = vrot.lane.b32.xlu1 %v1509_v34, %s1595_s14 }
0x1552   :  { %v1511_v36 = vpop.eup %1510 }
0x1553   :  { %v901_v37 = vadd.f32 1.0, %v1511_v36 }
0x1555   :  { %1512 = vrcp.f32 %v901_v37  ;;  %v913_v43 = vand.u32 2147483648, %v901_v37  ;;  %vm907_vm12 = vweird.f32 %v901_v37  ;;  %v911_v48 = vand.u32 2147483647, %v901_v37 }
0x1557   :  { %v914_v45 = vor.u32 1.1754944e-38, %v913_v43  ;;  %vm912_vm14 = vcmp.eq.f32.partialorder %v911_v48, 8.507059e+37 }
0x155b   :  { %v1513_v38 = vpop.eup %1512 }
0x155c   :  { %v903_v39 = vmul.f32 %v1513_v38, %v901_v37  ;;  %vm908_vm11 = vweird.f32 %v1513_v38 }
0x155d   :  { %vm909_vm13 = vmor %vm907_vm12, %vm908_vm11 }
0x155e   :  { %v904_v40 = vsub.f32 1.0, %v903_v39 }
0x1560   :  { %v905_v41 = vmul.f32 %v1513_v38, %v904_v40 }
0x1562   :  { %v906_v42 = vadd.f32 %v1513_v38, %v905_v41 }
0x1564   :  { %v910_v44 = vsel %vm909_vm13, %v1513_v38, %v906_v42 }
0x1565   :  { %v915_v46 = vsel %vm912_vm14, %v914_v45, %v910_v44 }
0x1566   :  { %v918_v50 = vmul.f32 %v915_v46, %v869_v26 }
0x15c3   :  { %v921_v17 = vpop.permute.xlu1 %920 }
0x15c4   :  { %v923_v49 = vmul.f32 %v921_v17, %v915_v46 }
0x15c6   :  { %925 = vrot.lane.b32.xlu2 %v923_v49, %s1598_s3 }
0x1620   :  { %v926_v52 = vpop.permute.xlu2 %925 }
0x1621   :  { %v928_v53 = vadd.f32 %v926_v52, %v918_v50  ;;  %v1053_v50 = vld [vmem:[#allocation2 + $0x8] sm:$0x3] }
0x1623   :  { %1514 = vtanh.f32 %v928_v53 }
0x1629   :  { %v1515_v54 = vpop.eup %1514 }
0x162a   :  { %931 = vrot.lane.b32.xlu0 %v1515_v54, %s1595_s14 }
0x169c   :  { %v932_v55 = vpop.permute.xlu0 %931 }
0x169d   :  { %v934_v56 = vmul.f32 %v932_v55, %v915_v46 }
0x169f   :  { %v936_v57 = vpack.c.bf16 %v934_v56, %v934_v56 }
0x16a1   :  { %938 = vrot.lane.b32.xlu1 %v936_v57, %s1598_s3 }
0x1713   :  { %v939_v12 = vpop.permute.xlu1 %938 }
0x1714   :  { %1399 = vmatmul.msk.bf16.vlgmr.msrb.gmra.mxu0 %vm146_vm6, %v939_v12 }
0x1791   :  { %v952_v59 = vpop.f32.mrf.mxu0 }
0x1792   :  { %v956_v60 = vadd.f32 %v952_v59, %v935_v58 }
0x1794   :  { %1516 = vtanh.f32 %v956_v60  ;;  %v1400_v63 = vmul.f32 -1.442695, %v956_v60 }
0x1796   :  { %1518 = vpow2.f32 %v1400_v63 }
0x1799   :  { %v954_v61 = vpop.f32.mrf.mxu0 }
0x179a   :  { %v1517_v62 = vpop.eup %1516 }
0x179b   :  { %979 = vrot.lane.b32.xlu2 %v1517_v62, %s1595_s14 }
0x179c   :  { %v1519_v0 = vpop.eup %1518 }
0x179d   :  { %v960_v1 = vadd.f32 1.0, %v1519_v0 }
0x179f   :  { %1520 = vrcp.f32 %v960_v1  ;;  %v972_v6 = vand.u32 2147483648, %v960_v1  ;;  %vm966_vm0 = vweird.f32 %v960_v1  ;;  %v970_v7 = vand.u32 2147483647, %v960_v1 }
0x17a1   :  { %v973_v9 = vor.u32 1.1754944e-38, %v972_v6  ;;  %vm971_vm2 = vcmp.eq.f32.partialorder %v970_v7, 8.507059e+37 }
0x17a5   :  { %v1521_v2 = vpop.eup %1520 }
0x17a6   :  { %v962_v3 = vmul.f32 %v1521_v2, %v960_v1  ;;  %vm967_vm15 = vweird.f32 %v1521_v2 }
0x17a7   :  { %vm968_vm1 = vmor %vm966_vm0, %vm967_vm15 }
0x17a8   :  { %v963_v4 = vsub.f32 1.0, %v962_v3 }
0x17aa   :  { %v964_v51 = vmul.f32 %v1521_v2, %v963_v4 }
0x17ac   :  { %v965_v5 = vadd.f32 %v1521_v2, %v964_v51 }
0x17ae   :  { %v969_v8 = vsel %vm968_vm1, %v1521_v2, %v965_v5 }
0x17af   :  { %v974_v10 = vsel %vm971_vm2, %v973_v9, %v969_v8 }
0x17b0   :  { %v977_v13 = vmul.f32 %v974_v10, %v928_v53 }
0x17f5   :  { %v980_v16 = vpop.permute.xlu2 %979 }
0x17f6   :  { %v982_v11 = vmul.f32 %v980_v16, %v974_v10 }
0x17f8   :  { %984 = vrot.lane.b32.xlu0 %v982_v11, %s1598_s3 }
0x186a   :  { %v985_v14 = vpop.permute.xlu0 %984 }
0x186b   :  { %v987_v15 = vadd.f32 %v985_v14, %v977_v13  ;;  %v1112_v13 = vld [vmem:[#allocation2 + $0xa] sm:$0x3] }
0x186d   :  { %1522 = vtanh.f32 %v987_v15 }
0x1873   :  { %v1523_v19 = vpop.eup %1522 }
0x1874   :  { %990 = vrot.lane.b32.xlu1 %v1523_v19, %s1595_s14 }
0x18e6   :  { %v991_v20 = vpop.permute.xlu1 %990 }
0x18e7   :  { %v993_v21 = vmul.f32 %v991_v20, %v974_v10 }
0x18e9   :  { %v995_v22 = vpack.c.bf16 %v993_v21, %v993_v21 }
0x18eb   :  { %997 = vrot.lane.b32.xlu2 %v995_v22, %s1598_s3 }
0x1945   :  { %v998_v23 = vpop.permute.xlu2 %997 }
0x1946   :  { %1401 = vmatmul.msk.bf16.vlgmr.msrb.gmra.mxu1 %vm146_vm6, %v998_v23 }
0x19c3   :  { %v1011_v25 = vpop.f32.mrf.mxu1 }
0x19c4   :  { %v1015_v26 = vadd.f32 %v1011_v25, %v994_v24 }
0x19c6   :  { %1524 = vtanh.f32 %v1015_v26  ;;  %v1402_v28 = vmul.f32 -1.442695, %v1015_v26 }
0x19c8   :  { %1526 = vpow2.f32 %v1402_v28 }
0x19cb   :  { %v1013_v27 = vpop.f32.mrf.mxu1 }
0x19cc   :  { %v1525_v18 = vpop.eup %1524 }
0x19cd   :  { %1038 = vrot.lane.b32.xlu0 %v1525_v18, %s1595_s14 }
0x19ce   :  { %v1527_v29 = vpop.eup %1526 }
0x19cf   :  { %v1019_v30 = vadd.f32 1.0, %v1527_v29 }
0x19d1   :  { %1528 = vrcp.f32 %v1019_v30  ;;  %v1031_v35 = vand.u32 2147483648, %v1019_v30  ;;  %vm1025_vm4 = vweird.f32 %v1019_v30  ;;  %v1029_v36 = vand.u32 2147483647, %v1019_v30 }
0x19d3   :  { %v1032_v38 = vor.u32 1.1754944e-38, %v1031_v35  ;;  %vm1030_vm7 = vcmp.eq.f32.partialorder %v1029_v36, 8.507059e+37 }
0x19d7   :  { %v1529_v31 = vpop.eup %1528 }
0x19d8   :  { %v1021_v32 = vmul.f32 %v1529_v31, %v1019_v30  ;;  %vm1026_vm3 = vweird.f32 %v1529_v31 }
0x19d9   :  { %vm1027_vm5 = vmor %vm1025_vm4, %vm1026_vm3 }
0x19da   :  { %v1022_v47 = vsub.f32 1.0, %v1021_v32 }
0x19dc   :  { %v1023_v33 = vmul.f32 %v1529_v31, %v1022_v47 }
0x19de   :  { %v1024_v34 = vadd.f32 %v1529_v31, %v1023_v33 }
0x19e0   :  { %v1028_v37 = vsel %vm1027_vm5, %v1529_v31, %v1024_v34 }
0x19e1   :  { %v1033_v40 = vsel %vm1030_vm7, %v1032_v38, %v1028_v37 }
0x19e2   :  { %v1036_v42 = vmul.f32 %v1033_v40, %v987_v15 }
0x1a3f   :  { %v1039_v39 = vpop.permute.xlu0 %1038 }
0x1a40   :  { %v1041_v41 = vmul.f32 %v1039_v39, %v1033_v40 }
0x1a42   :  { %1043 = vrot.lane.b32.xlu1 %v1041_v41, %s1598_s3 }
0x1ab4   :  { %v1044_v43 = vpop.permute.xlu1 %1043 }
0x1ab5   :  { %v1046_v48 = vadd.f32 %v1044_v43, %v1036_v42  ;;  %v1171_v42 = vld [vmem:[#allocation2 + $0xc] sm:$0x3] }
0x1ab7   :  { %1530 = vtanh.f32 %v1046_v48 }
0x1abd   :  { %v1531_v44 = vpop.eup %1530 }
0x1abe   :  { %1049 = vrot.lane.b32.xlu2 %v1531_v44, %s1595_s14 }
0x1b18   :  { %v1050_v45 = vpop.permute.xlu2 %1049 }
0x1b19   :  { %v1052_v17 = vmul.f32 %v1050_v45, %v1033_v40 }
0x1b1b   :  { %v1054_v46 = vpack.c.bf16 %v1052_v17, %v1052_v17 }
0x1b1d   :  { %1056 = vrot.lane.b32.xlu0 %v1054_v46, %s1598_s3 }
0x1b8f   :  { %v1057_v49 = vpop.permute.xlu0 %1056 }
0x1b90   :  { %1403 = vmatmul.msk.bf16.vlgmr.msrb.gmra.mxu2 %vm146_vm6, %v1057_v49 }
0x1c13   :  { %v1070_v52 = vpop.f32.mrf.mxu2 }
0x1c14   :  { %v1074_v53 = vadd.f32 %v1070_v52, %v1053_v50 }
0x1c16   :  { %1532 = vtanh.f32 %v1074_v53  ;;  %v1404_v56 = vmul.f32 -1.442695, %v1074_v53 }
0x1c18   :  { %1534 = vpow2.f32 %v1404_v56 }
0x1c1b   :  { %v1072_v54 = vpop.f32.mrf.mxu2 }
0x1c1c   :  { %v1533_v55 = vpop.eup %1532 }
0x1c1d   :  { %1097 = vrot.lane.b32.xlu1 %v1533_v55, %s1595_s14 }
0x1c1e   :  { %v1535_v57 = vpop.eup %1534 }
0x1c1f   :  { %v1078_v12 = vadd.f32 1.0, %v1535_v57 }
0x1c21   :  { %1536 = vrcp.f32 %v1078_v12  ;;  %v1090_v63 = vand.u32 2147483648, %v1078_v12  ;;  %vm1084_vm9 = vweird.f32 %v1078_v12  ;;  %v1088_v0 = vand.u32 2147483647, %v1078_v12 }
0x1c23   :  { %v1091_v2 = vor.u32 1.1754944e-38, %v1090_v63  ;;  %vm1089_vm11 = vcmp.eq.f32.partialorder %v1088_v0, 8.507059e+37 }
0x1c27   :  { %v1537_v58 = vpop.eup %1536 }
0x1c28   :  { %v1080_v59 = vmul.f32 %v1537_v58, %v1078_v12  ;;  %vm1085_vm8 = vweird.f32 %v1537_v58 }
0x1c29   :  { %vm1086_vm10 = vmor %vm1084_vm9, %vm1085_vm8 }
0x1c2a   :  { %v1081_v60 = vsub.f32 1.0, %v1080_v59 }
0x1c2c   :  { %v1082_v61 = vmul.f32 %v1537_v58, %v1081_v60 }
0x1c2e   :  { %v1083_v62 = vadd.f32 %v1537_v58, %v1082_v61 }
0x1c30   :  { %v1087_v1 = vsel %vm1086_vm10, %v1537_v58, %v1083_v62  ;;  %vm1333_vm10 = vcmask 33792  }
0x1c31   :  { %v1092_v4 = vsel %vm1089_vm11, %v1091_v2, %v1087_v1 }
0x1c32   :  { %v1095_v5 = vmul.f32 %v1092_v4, %v1046_v48 }
0x1c8f   :  { %v1098_v3 = vpop.permute.xlu1 %1097 }
0x1c90   :  { %v1100_v51 = vmul.f32 %v1098_v3, %v1092_v4 }
0x1c92   :  { %1102 = vrot.lane.b32.xlu2 %v1100_v51, %s1598_s3 }
0x1cec   :  { %v1103_v6 = vpop.permute.xlu2 %1102 }
0x1ced   :  { %v1105_v7 = vadd.f32 %v1103_v6, %v1095_v5  ;;  %v1230_v5 = vld [vmem:[#allocation2 + $0xe] sm:$0x3] }
0x1cef   :  { %1538 = vtanh.f32 %v1105_v7 }
0x1cf5   :  { %v1539_v8 = vpop.eup %1538 }
0x1cf6   :  { %1108 = vrot.lane.b32.xlu0 %v1539_v8, %s1595_s14 }
0x1d68   :  { %v1109_v9 = vpop.permute.xlu0 %1108 }
0x1d69   :  { %v1111_v16 = vmul.f32 %v1109_v9, %v1092_v4 }
0x1d6b   :  { %v1113_v10 = vpack.c.bf16 %v1111_v16, %v1111_v16 }
0x1d6d   :  { %1115 = vrot.lane.b32.xlu1 %v1113_v10, %s1598_s3 }
0x1ddf   :  { %v1116_v11 = vpop.permute.xlu1 %1115 }
0x1de0   :  { %1405 = vmatmul.msk.bf16.vlgmr.msrb.gmra.mxu3 %vm146_vm6, %v1116_v11 }
0x1e63   :  { %v1129_v14 = vpop.f32.mrf.mxu3 }
0x1e64   :  { %v1133_v15 = vadd.f32 %v1129_v14, %v1112_v13 }
0x1e66   :  { %1540 = vtanh.f32 %v1133_v15  ;;  %v1406_v21 = vmul.f32 -1.442695, %v1133_v15 }
0x1e68   :  { %1542 = vpow2.f32 %v1406_v21 }
0x1e6b   :  { %v1131_v19 = vpop.f32.mrf.mxu3 }
0x1e6c   :  { %v1541_v20 = vpop.eup %1540 }
0x1e6d   :  { %1156 = vrot.lane.b32.xlu2 %v1541_v20, %s1595_s14 }
0x1e6e   :  { %v1543_v22 = vpop.eup %1542 }
0x1e6f   :  { %v1137_v23 = vadd.f32 1.0, %v1543_v22 }
0x1e71   :  { %1544 = vrcp.f32 %v1137_v23  ;;  %v1149_v28 = vand.u32 2147483648, %v1137_v23  ;;  %vm1143_vm13 = vweird.f32 %v1137_v23  ;;  %v1147_v29 = vand.u32 2147483647, %v1137_v23 }
0x1e73   :  { %v1150_v31 = vor.u32 1.1754944e-38, %v1149_v28  ;;  %vm1148_vm15 = vcmp.eq.f32.partialorder %v1147_v29, 8.507059e+37 }
0x1e77   :  { %v1545_v24 = vpop.eup %1544 }
0x1e78   :  { %v1139_v25 = vmul.f32 %v1545_v24, %v1137_v23  ;;  %vm1144_vm12 = vweird.f32 %v1545_v24 }
0x1e79   :  { %vm1145_vm14 = vmor %vm1143_vm13, %vm1144_vm12 }
0x1e7a   :  { %v1140_v26 = vsub.f32 1.0, %v1139_v25 }
0x1e7c   :  { %v1141_v27 = vmul.f32 %v1545_v24, %v1140_v26 }
0x1e7e   :  { %v1142_v18 = vadd.f32 %v1545_v24, %v1141_v27 }
0x1e80   :  { %v1146_v30 = vsel %vm1145_vm14, %v1545_v24, %v1142_v18 }
0x1e81   :  { %v1151_v47 = vsel %vm1148_vm15, %v1150_v31, %v1146_v30  ;;  %v1427_v31 = vld [vmem:[%s1863_s7 + $0x8] sm:$0xff] }
0x1e82   :  { %v1154_v34 = vmul.f32 %v1151_v47, %v1105_v7  ;;  %1322 = vmatpush.bf16.msra.mxu2 %v1427_v31 }
0x1ec7   :  { %v1157_v32 = vpop.permute.xlu2 %1156 }
0x1ec8   :  { %v1159_v33 = vmul.f32 %v1157_v32, %v1151_v47  ;;  %v1426_v32 = vld [vmem:[%s1863_s7] sm:$0xff] }
0x1ec9   :  { %1323 = vmatpush.bf16.msra.mxu2 %v1426_v32 }
0x1eca   :  { %1161 = vrot.lane.b32.xlu0 %v1159_v33, %s1598_s3 }
0x1f3c   :  { %v1162_v35 = vpop.permute.xlu0 %1161 }
0x1f3d   :  { %v1164_v36 = vadd.f32 %v1162_v35, %v1154_v34 }
0x1f3f   :  { %1546 = vtanh.f32 %v1164_v36 }
0x1f45   :  { %v1547_v37 = vpop.eup %1546 }
0x1f46   :  { %1167 = vrot.lane.b32.xlu1 %v1547_v37, %s1595_s14 }
0x1fb8   :  { %v1168_v38 = vpop.permute.xlu1 %1167 }
0x1fb9   :  { %v1170_v39 = vmul.f32 %v1168_v38, %v1151_v47  ;;  %v1435_v38 = vld [vmem:[%s1864_s8] ss:$0 sm:$0xff] }
0x1fbb   :  { %v1172_v40 = vpack.c.bf16 %v1170_v39, %v1170_v39 }
0x1fbd   :  { %1174 = vrot.lane.b32.xlu2 %v1172_v40, %s1598_s3 }
0x2017   :  { %v1175_v41 = vpop.permute.xlu2 %1174 }
0x2018   :  { %1407 = vmatmul.msk.bf16.vlgmr.msra.gmra.mxu0 %vm146_vm6, %v1175_v41 }
0x2095   :  { %v1188_v43 = vpop.f32.mrf.mxu0 }
0x2096   :  { %v1192_v48 = vadd.f32 %v1188_v43, %v1171_v42 }
0x2098   :  { %1548 = vtanh.f32 %v1192_v48  ;;  %v1408_v17 = vmul.f32 -1.442695, %v1192_v48 }
0x209a   :  { %1550 = vpow2.f32 %v1408_v17 }
0x209d   :  { %v1190_v44 = vpop.f32.mrf.mxu0 }
0x209e   :  { %v1549_v45 = vpop.eup %1548 }
0x209f   :  { %1215 = vrot.lane.b32.xlu0 %v1549_v45, %s1595_s14 }
0x20a0   :  { %v1551_v46 = vpop.eup %1550 }
0x20a1   :  { %v1196_v49 = vadd.f32 1.0, %v1551_v46 }
0x20a3   :  { %1552 = vrcp.f32 %v1196_v49  ;;  %v1208_v56 = vand.u32 2147483648, %v1196_v49  ;;  %vm1202_vm1 = vweird.f32 %v1196_v49  ;;  %v1206_v57 = vand.u32 2147483647, %v1196_v49 }
0x20a5   :  { %v1209_v58 = vor.u32 1.1754944e-38, %v1208_v56  ;;  %vm1207_vm3 = vcmp.eq.f32.partialorder %v1206_v57, 8.507059e+37 }
0x20a9   :  { %v1553_v50 = vpop.eup %1552 }
0x20aa   :  { %v1198_v52 = vmul.f32 %v1553_v50, %v1196_v49  ;;  %vm1203_vm0 = vweird.f32 %v1553_v50 }
0x20ab   :  { %vm1204_vm2 = vmor %vm1202_vm1, %vm1203_vm0 }
0x20ac   :  { %v1199_v53 = vsub.f32 1.0, %v1198_v52 }
0x20ae   :  { %v1200_v54 = vmul.f32 %v1553_v50, %v1199_v53 }
0x20b0   :  { %v1201_v55 = vadd.f32 %v1553_v50, %v1200_v54 }
0x20b2   :  { %v1205_v12 = vsel %vm1204_vm2, %v1553_v50, %v1201_v55 }
0x20b3   :  { %v1210_v60 = vsel %vm1207_vm3, %v1209_v58, %v1205_v12 }
0x20b4   :  { %v1213_v62 = vmul.f32 %v1210_v60, %v1164_v36  ;;  %v1329_v36 = vlaneseq }
0x20b6   :  { %v1330_v37 = vand.u32 127, %v1329_v36 }
0x20b8   :  { %vm1331_vm9 = vcmp.lt.s32.totalorder %v1330_v37, 2 }
0x2111   :  { %v1216_v59 = vpop.permute.xlu0 %1215 }
0x2112   :  { %v1218_v61 = vmul.f32 %v1216_v59, %v1210_v60 }
0x2114   :  { %1220 = vrot.lane.b32.xlu1 %v1218_v61, %s1598_s3 }
0x2186   :  { %v1221_v63 = vpop.permute.xlu1 %1220 }
0x2187   :  { %v1223_v0 = vadd.f32 %v1221_v63, %v1213_v62 }
0x2189   :  { %1554 = vtanh.f32 %v1223_v0 }
0x218f   :  { %v1555_v1 = vpop.eup %1554 }
0x2190   :  { %1226 = vrot.lane.b32.xlu2 %v1555_v1, %s1595_s14 }
0x21ea   :  { %v1227_v2 = vpop.permute.xlu2 %1226 }
0x21eb   :  { %v1229_v3 = vmul.f32 %v1227_v2, %v1210_v60 }
0x21ed   :  { %v1231_v4 = vpack.c.bf16 %v1229_v3, %v1229_v3 }
0x21ef   :  { %1233 = vrot.lane.b32.xlu0 %v1231_v4, %s1598_s3 }
0x2261   :  { %v1234_v51 = vpop.permute.xlu0 %1233 }
0x2262   :  { %1409 = vmatmul.msk.bf16.vlgmr.msra.gmra.mxu1 %vm146_vm6, %v1234_v51 }
0x22df   :  { %v1247_v6 = vpop.f32.mrf.mxu1 }
0x22e0   :  { %v1251_v7 = vadd.f32 %v1247_v6, %v1230_v5 }
0x22e2   :  { %1556 = vtanh.f32 %v1251_v7  ;;  %v1410_v16 = vmul.f32 -1.442695, %v1251_v7 }
0x22e4   :  { %1558 = vpow2.f32 %v1410_v16 }
0x22e7   :  { %v1249_v8 = vpop.f32.mrf.mxu1 }
0x22e8   :  { %v1557_v9 = vpop.eup %1556 }
0x22e9   :  { %1274 = vrot.lane.b32.xlu1 %v1557_v9, %s1595_s14 }
0x22ea   :  { %v1559_v10 = vpop.eup %1558 }
0x22eb   :  { %v1255_v11 = vadd.f32 1.0, %v1559_v10 }
0x22ed   :  { %1560 = vrcp.f32 %v1255_v11  ;;  %v1267_v21 = vand.u32 2147483648, %v1255_v11  ;;  %vm1261_vm5 = vweird.f32 %v1255_v11  ;;  %v1265_v22 = vand.u32 2147483647, %v1255_v11 }
0x22ef   :  { %v1268_v24 = vor.u32 1.1754944e-38, %v1267_v21  ;;  %vm1266_vm8 = vcmp.eq.f32.partialorder %v1265_v22, 8.507059e+37 }
0x22f3   :  { %v1561_v13 = vpop.eup %1560 }
0x22f4   :  { %v1257_v14 = vmul.f32 %v1561_v13, %v1255_v11  ;;  %vm1262_vm4 = vweird.f32 %v1561_v13 }
0x22f5   :  { %vm1263_vm7 = vmor %vm1261_vm5, %vm1262_vm4 }
0x22f6   :  { %v1258_v15 = vsub.f32 1.0, %v1257_v14 }
0x22f8   :  { %v1259_v19 = vmul.f32 %v1561_v13, %v1258_v15 }
0x22fa   :  { %v1260_v20 = vadd.f32 %v1561_v13, %v1259_v19 }
0x22fc   :  { %v1264_v23 = vsel %vm1263_vm7, %v1561_v13, %v1260_v20 }
0x22fd   :  { %v1269_v26 = vsel %vm1266_vm8, %v1268_v24, %v1264_v23 }
0x22fe   :  { %v1272_v18 = vmul.f32 %v1269_v26, %v1223_v0 }
0x235b   :  { %v1275_v25 = vpop.permute.xlu1 %1274 }
0x235c   :  { %v1277_v27 = vmul.f32 %v1275_v25, %v1269_v26 }
0x235e   :  { %1279 = vrot.lane.b32.xlu2 %v1277_v27, %s1598_s3 }
0x23b8   :  { %v1280_v28 = vpop.permute.xlu2 %1279 }
0x23b9   :  { %v1282_v29 = vadd.f32 %v1280_v28, %v1272_v18 }
0x23bb   :  { %1562 = vtanh.f32 %v1282_v29 }
0x23c1   :  { %v1563_v30 = vpop.eup %1562 }
0x23c2   :  { %1285 = vrot.lane.b32.xlu0 %v1563_v30, %s1595_s14 }
0x2434   :  { %v1286_v47 = vpop.permute.xlu0 %1285 }
0x2435   :  { %v1288_v33 = vmul.f32 %v1286_v47, %v1269_v26 }
0x2437   :  { %v1289_v34 = vpack.c.bf16 %v1288_v33, %v1288_v33 }
0x2439   :  { %1299 = vrot.lane.b32.xlu1 %v1289_v34, %s1598_s3 }
0x24ab   :  { %v1300_v35 = vpop.permute.xlu1 %1299 }
0x24ac   :  { %1419 = vmatmul.msk.bf16.vlgmr.msra.gmra.mxu2 %vm146_vm6, %v1300_v35 }
0x252f   :  { %v1325_v39 = vpop.f32.mrf.mxu2 }
0x2530   :  { %v1326_v40 = vadd.f32 %v1435_v38, %v1325_v39 }
0x2532   :  { %v1332_v41 = vsel %vm1331_vm9, %v1326_v40, -inf }
0x2533   :  { %v1334_v42 = vsel %vm1333_vm10, %v1332_v41, -inf }
0x2534   :  { %1335 = vmax.xlane.f32.xlu2 %v1334_v42 }
0x2537   :  { %v1327_v43 = vpop.f32.mrf.mxu2 }
0x25a7   :  { %v1336_v48 = vpop.xlane.xlu2 %1335 }
0x25a8   :  { %v1337_v44 = vsub.f32 %v1326_v40, %v1336_v48 }
0x25aa   :  { %v1338_v45 = vsel %vm1331_vm9, %v1337_v44, -inf }
0x25ab   :  { %v1339_v17 = vmul.f32 1.442695, %v1338_v45 }
0x25ad   :  { %1564 = vpow2.f32 %v1339_v17 }
0x25b3   :  { %v1565_v46 = vpop.eup %1564 }
0x25b4   :  { %v1341_v49 = vsel %vm1333_vm10, %v1565_v46, 0.0 }
0x25b5   :  { %1342 = vadd.xlane.f32.xlu0 %v1341_v49 }
0x2628   :  { %v1343_v50 = vpop.xlane.xlu0 %1342 }
0x2629   :  { %1566 = vlog2.f32 %v1343_v50 }
0x262f   :  { %v1567_v52 = vpop.eup %1566 }
0x2630   :  { %v1345_v53 = vmul.f32 0.6931472, %v1567_v52 }
0x2632   :  { %v1346_v54 = vadd.f32 %v1345_v53, %v1336_v48 }
0x2634   :  { %v1347_v55 = vsub.f32 %v1326_v40, %v1346_v54 }
0x2636   :  { %v1348_v56 = vsel %vm1331_vm9, %v1347_v55, %v1326_v40 }
0x2637   :  { %1349 = vst.msk [vmem:[%s1865_s9] sm:$0x3] %vm1333_vm10, %v1348_v56 }
0x2638   :  { %1354 = vsyncpa [#allocation5], 1 }

</bundles_post_ra>
